<compile_context>
chip_gen: v7x
topology: tpu7x:2x2x1
jax: 0.10.0
libtpu: 0.0.40
codegen_flags: <defaults>
</compile_context>

<pallas_src>
import functools
from typing import NamedTuple

import jax
import jax.numpy as jnp
from jax.experimental import pallas as pl
from jax.experimental.pallas import tpu as pltpu

LANE = 128        # vreg lane width: feature dims are zero-padded to this
SUBLANE = 8       # vreg sublane width
MXU_TILE = 256    # v6e/v7x MXU width; multi-step batch tiles are 256-aligned.
                  # (If you control the model config, prefer num_units and the
                  #  flattened input_dim as real multiples of 256 on v6e/v7x:
                  #  zero-padding 128->256 costs the same MXU cycles without
                  #  adding useful FLOPs.  128 is already optimal on v5e.)


def _round_up(x, m):
    return ((x + m - 1) // m) * m


def _round_down(x, m):
    return (x // m) * m


def _vmem_capacity_bytes():
    """Best-effort physical VMEM per core; conservative (v7x) fallback."""
    try:
        info = pltpu.get_tpu_info()
        cap = int(getattr(info, "vmem_capacity_bytes", 0) or 0)
        if cap > 0:
            return cap
    except Exception:
        pass
    return 64 * 1024 * 1024   # v7x per-TensorCore VMEM = tightest generation


class PreparedAuxlParams(NamedTuple):
    """Padded / transposed / cast parameters (build once, reuse every call)."""
    layers: tuple            # ((wT, b_col), ...)  wT: (out_p, in_p) compute dtype
                             #                     b_col: (out_p, 1) float32
    input_dim: int
    in_dim_p: int
    compute_dtype: object


def prepare_params(params, compute_dtype=jnp.bfloat16):
    """Pad feature dims to LANE multiples, transpose weights to (out, in) and
    cast to the compute dtype.  Call once and reuse across forward calls (the
    review's 'cache padded params' item)."""
    num_linear = len(params)
    assert num_linear >= 1 and params[-1][0].shape[1] == 1

    input_dim = int(jnp.asarray(params[0][0]).shape[0])
    prev_logical = input_dim
    prev_p = _round_up(input_dim, LANE)
    in_dim_p = prev_p

    layers = []
    for li, (w, b) in enumerate(params):
        w = jnp.asarray(w, jnp.float32)
        fan_in, fan_out = int(w.shape[0]), int(w.shape[1])
        assert fan_in == prev_logical, "layer shapes must chain"
        b = jnp.asarray(b, jnp.float32).reshape(fan_out)
        last = li == num_linear - 1
        out_p = 1 if last else _round_up(fan_out, LANE)
        # Store W transposed (out, in), zero-padded: the kernel's GEMMs then run
        # in native (no-transpose) MXU orientation with the batch on lanes.
        wT = jnp.zeros((out_p, prev_p), jnp.float32).at[:fan_out, :fan_in].set(w.T)
        bc = jnp.zeros((out_p, 1), jnp.float32).at[:fan_out, 0].set(b)
        layers.append((wT.astype(compute_dtype), bc))
        prev_logical, prev_p = fan_out, out_p

    return PreparedAuxlParams(tuple(layers), input_dim, in_dim_p, compute_dtype)


def _group_param_bytes(group):
    return sum(int(wT.size) * wT.dtype.itemsize + int(b.size) * b.dtype.itemsize
               for wT, b in group)


def _per_col_vmem_bytes(group, has_final, cd_bytes):
    """Approximate VMEM bytes needed per batch column for one group's call."""
    f_in_p = group[0][0].shape[1]
    widths = [f_in_p] + [wT.shape[0] for wT, _ in group]
    act = 2 * max(widths) * 4                       # two live f32 activations
    x_io = 2 * f_in_p * cd_bytes                    # x tile, double-buffered
    if has_final:
        out_io = 2 * 1 * 4                          # (1, block_b) f32, 2 bufs
    else:
        out_io = 2 * group[-1][0].shape[0] * cd_bytes
    return x_io + out_io + act


def _mlp_group_kernel(n_layers, has_final, compute_dtype, *refs):
    """refs = (x, w0T, b0, ..., w_{n-1}T, b_{n-1}, out); activations are
    (features, batch) so every GEMM is LHS-stationary / native orientation."""
    x_ref = refs[0]
    out_ref = refs[-1]
    p = refs[1:-1]
    assert len(p) == 2 * n_layers

    h = x_ref[...]                                   # (F_in_p, block_b) compute dt
    n_hidden = n_layers - 1 if has_final else n_layers
    for i in range(n_hidden):
        wT = p[2 * i][...]                           # (F_out_p, F_in_p) compute dt
        b = p[2 * i + 1][...]                        # (F_out_p, 1)      f32
        h = jnp.dot(wT, h, preferred_element_type=jnp.float32) + b
        h = jnp.maximum(h, 0.0).astype(compute_dtype)
    if has_final:
        wT = p[-2][...]                              # (1, H_p) compute dt
        b = p[-1][...]                               # (1, 1)   f32
        h = jnp.dot(wT, h, preferred_element_type=jnp.float32) + b
    out_ref[...] = h.astype(out_ref.dtype)


def _run_group(x_t, group, has_final, block_b, num_blocks, B_pad,
               compute_dtype, vmem_limit):
    f_in_p = group[0][0].shape[1]
    flat = [x_t]
    for wT, b in group:
        flat += [wT, b]

    if has_final:
        out_shape = jax.ShapeDtypeStruct((1, B_pad), jnp.float32)
        out_spec = pl.BlockSpec((1, block_b), lambda i: (0, i))
    else:
        f_out_p = group[-1][0].shape[0]
        out_shape = jax.ShapeDtypeStruct((f_out_p, B_pad), compute_dtype)
        out_spec = pl.BlockSpec((f_out_p, block_b), lambda i: (0, i))

    kernel = functools.partial(_mlp_group_kernel, len(group), has_final,
                               compute_dtype)

    def build_specs(single_buffer_weights):
        # x tile keeps the default double buffering (prefetch overlaps compute).
        specs = [pl.BlockSpec((f_in_p, block_b), lambda i: (0, i))]
        for wT, b in group:
            if single_buffer_weights:
                # Grid-invariant blocks: single VMEM buffer (no re-DMA anyway).
                specs.append(pl.BlockSpec(wT.shape, lambda i: (0, 0),
                                          pipeline_mode=pl.Buffered(1)))
                specs.append(pl.BlockSpec(b.shape, lambda i: (0, 0),
                                          pipeline_mode=pl.Buffered(1)))
            else:
                specs.append(pl.BlockSpec(wT.shape, lambda i: (0, 0)))
                specs.append(pl.BlockSpec(b.shape, lambda i: (0, 0)))
        return specs

    def call(single_buffer_weights):
        return pl.pallas_call(
            kernel,
            out_shape=out_shape,
            grid=(num_blocks,),
            in_specs=build_specs(single_buffer_weights),
            out_specs=out_spec,
            compiler_params=pltpu.CompilerParams(
                dimension_semantics=("parallel",),
                vmem_limit_bytes=vmem_limit),
        )(*flat)

    try:
        return call(True)
    except Exception:
        # Fallback for jax builds without Buffered(1) support on BlockSpec:
        # default double-buffered weight specs (costs VMEM, not correctness).
        return call(False)


def auxl_discriminator_forward(attribute, params, *, block_b=None,
                               compute_dtype=jnp.bfloat16,
                               max_group_param_bytes=None):
    """Forward pass of AuxlDiscriminator.

    attribute: (B, ...) array; flattened to (B, input_dim) row-major.
    params:    either a list of (W, b) with W (in_features, out_features)
               (PyTorch nn.Linear weight transposed) and b (out_features,) /
               (1, out_features), or a PreparedAuxlParams (preferred: build it
               once with prepare_params and reuse).
    returns:   (B,) float32 logits, matching x.squeeze(1).
    """
    if isinstance(params, PreparedAuxlParams):
        prepared = params
    else:
        prepared = prepare_params(params, compute_dtype)
    cd = prepared.compute_dtype
    cd_bytes = jnp.dtype(cd).itemsize

    B = attribute.shape[0]
    x2d = attribute.reshape(B, -1)
    assert x2d.shape[1] == prepared.input_dim, "input_dim mismatch"

    vmem_cap = _vmem_capacity_bytes()
    vmem_budget = (vmem_cap * 3) // 4              # headroom for compiler scratch

    # ---- capacity guard: group layers so each group's params fit VMEM --------
    group_budget = max_group_param_bytes
    if group_budget is None:
        group_budget = max(vmem_budget // 2, 1)
    groups, cur, cur_bytes = [], [], 0
    for layer in prepared.layers:
        lb = _group_param_bytes([layer])
        if cur and cur_bytes + lb > group_budget:
            groups.append(cur)
            cur, cur_bytes = [], 0
        cur.append(layer)
        cur_bytes += lb
    groups.append(cur)
    # TODO(synk): if a single layer's padded weights alone exceed the VMEM
    # budget, tile its contraction dim with an f32 accumulator over an
    # 'arbitrary' K grid axis instead of relying on per-group splitting.

    n_groups = len(groups)
    worst_params = max(_group_param_bytes(g) for g in groups)
    worst_col = max(_per_col_vmem_bytes(g, gi == n_groups - 1, cd_bytes)
                    for gi, g in enumerate(groups))

    # ---- pick the batch tile --------------------------------------------------
    if block_b is None:
        if B <= 256:
            block_b = _round_up(B, SUBLANE)        # one tile; problem is tiny
        else:
            # Fat 256-aligned tiles, >= 4 grid steps (>= 2 per v7x TensorCore)
            # so the x-tile prefetch hides behind compute, capped by the VMEM
            # left over after the single-buffered weights.
            avail = max(vmem_budget - worst_params - (2 << 20), 0)
            cap_rows = max(_round_down(avail // max(worst_col, 1), MXU_TILE),
                           MXU_TILE)
            want = _round_up(-(-B // 4), MXU_TILE)
            block_b = int(min(2048, cap_rows, max(MXU_TILE, want)))
    else:
        block_b = max(SUBLANE, _round_up(int(block_b), SUBLANE))
        if _round_up(B, block_b) > block_b:        # more than one tile
            block_b = _round_up(block_b, LANE)     # keep output blocks lane-aligned
    B_pad = _round_up(B, block_b)
    num_blocks = B_pad // block_b

    # ---- VMEM limit from the actual footprint, clamped per generation --------
    need = 2 * worst_params + worst_col * block_b + (4 << 20)
    vmem_limit = int(min(max(need, 32 << 20), max(vmem_budget, 32 << 20)))

    # ---- one-pass input prep: cast -> transpose -> zero-pad -------------------
    x_t = jnp.pad(x2d.astype(cd).T,
                  ((0, prepared.in_dim_p - prepared.input_dim),
                   (0, B_pad - B)))                # (in_dim_p, B_pad) compute dt

    h = x_t
    for gi, group in enumerate(groups):
        h = _run_group(h, group, gi == n_groups - 1, block_b, num_blocks,
                       B_pad, cd, vmem_limit)
    return h[0, :B]


# --------------------------------------------------------------------------- #
# Reference / test harness
# --------------------------------------------------------------------------- #
def init_params(key, input_dim, num_layers, num_units):
    """Deterministic init mirroring nn.Linear default U(-1/sqrt(fan_in), +)."""
    params = []
    dims = []
    for i in range(num_layers - 1):
        dims.append((input_dim if i == 0 else num_units, num_units))
    dims.append((num_units, 1))
    for fan_in, fan_out in dims:
        key, kw, kb = jax.random.split(key, 3)
        bound = 1.0 / float(jnp.sqrt(jnp.float32(fan_in)))
        w = jax.random.uniform(kw, (fan_in, fan_out), jnp.float32, -bound, bound)
        b = jax.random.uniform(kb, (1, fan_out), jnp.float32, -bound, bound)
        params.append((w, b))
    return params


def _reference_forward(attribute, params):
    x = attribute.reshape(attribute.shape[0], -1).astype(jnp.float32)
    n = len(params)
    for i, (w, b) in enumerate(params):
        x = jnp.dot(x, w, precision=jax.lax.Precision.HIGHEST) + b.reshape(1, -1)
        if i < n - 1:
            x = jnp.maximum(x, 0.0)
    return x[:, 0]


if __name__ == "__main__":
    key = jax.random.PRNGKey(0)

    def run_case(k, batch, attr_dim, num_layers, num_units, block_b=None,
                 max_group_param_bytes=None):
        k_attr, k_params = jax.random.split(k)
        attribute = jax.random.normal(k_attr, (batch, attr_dim), jnp.float32)
        params = init_params(k_params, attr_dim, num_layers, num_units)
        ref = _reference_forward(attribute, params)

        # Exact path (f32 compute, f32 accumulation) - tight tolerance.
        prep32 = prepare_params(params, jnp.float32)     # pad/cast once, reuse
        out_f32 = jax.block_until_ready(
            auxl_discriminator_forward(
                attribute, prep32, block_b=block_b,
                max_group_param_bytes=max_group_param_bytes))
        assert out_f32.shape == (batch,)
        err32 = float(jnp.max(jnp.abs(out_f32 - ref)))
        assert jnp.allclose(out_f32, ref, atol=1e-4, rtol=1e-4), ("f32", err32)

        # Fast path (bf16 weights/activations, f32 accumulation) - loose tol.
        prepbf = prepare_params(params, jnp.bfloat16)
        out_bf = jax.block_until_ready(
            auxl_discriminator_forward(
                attribute, prepbf, block_b=block_b,
                max_group_param_bytes=max_group_param_bytes))
        assert out_bf.shape == (batch,)
        errbf = float(jnp.max(jnp.abs(out_bf - ref)))
        assert jnp.allclose(out_bf, ref, atol=3e-2, rtol=3e-2), ("bf16", errbf)

    k1, k2, k3 = jax.random.split(key, 3)
    # Small shapes consistent with the module: attribute (B, A) -> input_dim=A.
    run_case(k1, batch=8, attr_dim=16, num_layers=3, num_units=32)
    # Non-divisible batch + explicit multi-step grid (batch padding + tiling).
    run_case(k2, batch=200, attr_dim=16, num_layers=4, num_units=48, block_b=128)
    # Default multi-tile heuristic + forced per-layer group split (exercises the
    # v7x capacity-guard fallback path on toy shapes).
    run_case(k3, batch=300, attr_dim=16, num_layers=3, num_units=32,
             max_group_param_bytes=1)

    print("KERNEL_OK")
</pallas_src>

<mosaic_0001>
module attributes {stable_mosaic.version = 11 : i64} {
  func.func @_mlp_group_kernel(%arg0: i32, %arg1: memref<128x8xf32, #tpu.memory_space<vmem>>, %arg2: memref<128x128xf32, #tpu.memory_space<vmem>>, %arg3: memref<128x1xf32, #tpu.memory_space<vmem>>, %arg4: memref<128x128xf32, #tpu.memory_space<vmem>>, %arg5: memref<128x1xf32, #tpu.memory_space<vmem>>, %arg6: memref<1x128xf32, #tpu.memory_space<vmem>>, %arg7: memref<1x1xf32, #tpu.memory_space<vmem>>, %arg8: memref<1x8xf32, #tpu.memory_space<vmem>>) attributes {dimension_semantics = [#tpu.dimension_semantics<parallel>], iteration_bounds = array<i64: 1>, scalar_prefetch = 0 : i64, scratch_operands = 0 : i64, tpu.core_type = #tpu.core_type<tc>, window_params = [{transform_indices = @transform_0, window_bounds = array<i64: 128, 8>}, {pipeline_mode = #tpu.pipeline_mode<synchronous>, transform_indices = @transform_1, window_bounds = array<i64: 128, 128>}, {pipeline_mode = #tpu.pipeline_mode<synchronous>, transform_indices = @transform_2, window_bounds = array<i64: 128, 1>}, {pipeline_mode = #tpu.pipeline_mode<synchronous>, transform_indices = @transform_3, window_bounds = array<i64: 128, 128>}, {pipeline_mode = #tpu.pipeline_mode<synchronous>, transform_indices = @transform_4, window_bounds = array<i64: 128, 1>}, {pipeline_mode = #tpu.pipeline_mode<synchronous>, transform_indices = @transform_5, window_bounds = array<i64: 1, 128>}, {pipeline_mode = #tpu.pipeline_mode<synchronous>, transform_indices = @transform_6, window_bounds = array<i64: 1, 1>}, {transform_indices = @transform_7, window_bounds = array<i64: 1, 8>}]} {
    %c0 = arith.constant 0 : index
    %c0_0 = arith.constant 0 : index
    %0 = vector.load %arg1[%c0, %c0_0] : memref<128x8xf32, #tpu.memory_space<vmem>>, vector<128x8xf32>
    %c0_1 = arith.constant 0 : index
    %c0_2 = arith.constant 0 : index
    %1 = vector.load %arg2[%c0_1, %c0_2] : memref<128x128xf32, #tpu.memory_space<vmem>>, vector<128x128xf32>
    %c0_3 = arith.constant 0 : index
    %c0_4 = arith.constant 0 : index
    %2 = vector.load %arg3[%c0_3, %c0_4] : memref<128x1xf32, #tpu.memory_space<vmem>>, vector<128x1xf32>
    %cst = arith.constant dense<0.000000e+00> : vector<128x8xf32>
    %3 = tpu.matmul %1, %0, %cst {dimension_numbers = #tpu.dot_dimension_numbers<[1], [0], [0], [1], [0, 0, 1, 1], [], []>} : vector<128x128xf32>, vector<128x8xf32>, vector<128x8xf32> -> vector<128x8xf32>
    %4 = vector.broadcast %2 : vector<128x1xf32> to vector<128x8xf32>
    %5 = arith.addf %3, %4 : vector<128x8xf32>
    %cst_5 = arith.constant 0.000000e+00 : f32
    %6 = vector.broadcast %cst_5 : f32 to vector<128x8xf32>
    %7 = arith.maximumf %5, %6 : vector<128x8xf32>
    %c0_6 = arith.constant 0 : index
    %c0_7 = arith.constant 0 : index
    %8 = vector.load %arg4[%c0_6, %c0_7] : memref<128x128xf32, #tpu.memory_space<vmem>>, vector<128x128xf32>
    %c0_8 = arith.constant 0 : index
    %c0_9 = arith.constant 0 : index
    %9 = vector.load %arg5[%c0_8, %c0_9] : memref<128x1xf32, #tpu.memory_space<vmem>>, vector<128x1xf32>
    %cst_10 = arith.constant dense<0.000000e+00> : vector<128x8xf32>
    %10 = tpu.matmul %8, %7, %cst_10 {dimension_numbers = #tpu.dot_dimension_numbers<[1], [0], [0], [1], [0, 0, 1, 1], [], []>} : vector<128x128xf32>, vector<128x8xf32>, vector<128x8xf32> -> vector<128x8xf32>
    %11 = vector.broadcast %9 : vector<128x1xf32> to vector<128x8xf32>
    %12 = arith.addf %10, %11 : vector<128x8xf32>
    %cst_11 = arith.constant 0.000000e+00 : f32
    %13 = vector.broadcast %cst_11 : f32 to vector<128x8xf32>
    %14 = arith.maximumf %12, %13 : vector<128x8xf32>
    %c0_12 = arith.constant 0 : index
    %c0_13 = arith.constant 0 : index
    %15 = vector.load %arg6[%c0_12, %c0_13] : memref<1x128xf32, #tpu.memory_space<vmem>>, vector<1x128xf32>
    %c0_14 = arith.constant 0 : index
    %c0_15 = arith.constant 0 : index
    %16 = vector.load %arg7[%c0_14, %c0_15] : memref<1x1xf32, #tpu.memory_space<vmem>>, vector<1x1xf32>
    %cst_16 = arith.constant dense<0.000000e+00> : vector<1x8xf32>
    %17 = tpu.matmul %15, %14, %cst_16 {dimension_numbers = #tpu.dot_dimension_numbers<[1], [0], [0], [1], [0, 0, 1, 1], [], []>} : vector<1x128xf32>, vector<128x8xf32>, vector<1x8xf32> -> vector<1x8xf32>
    %18 = vector.broadcast %16 : vector<1x1xf32> to vector<1x8xf32>
    %19 = arith.addf %17, %18 : vector<1x8xf32>
    %c0_17 = arith.constant 0 : index
    %c0_18 = arith.constant 0 : index
    %20 = vector.load %arg8[%c0_17, %c0_18] : memref<1x8xf32, #tpu.memory_space<vmem>>, vector<1x8xf32>
    tpu.vector_store %arg8[%c0_17, %c0_18], %19 {strides = array<i32>} : memref<1x8xf32, #tpu.memory_space<vmem>>, vector<1x8xf32>,
    return
  }
  func.func @transform_0(%arg0: i32) -> (i32, i32) {
    %c0_i32 = arith.constant 0 : i32
    %c0_i32_0 = arith.constant 0 : i32
    return %c0_i32, %arg0 : i32, i32
  }
  func.func @transform_1(%arg0: i32) -> (i32, i32) {
    %c0_i32 = arith.constant 0 : i32
    %c0_i32_0 = arith.constant 0 : i32
    %c0_i32_1 = arith.constant 0 : i32
    return %c0_i32, %c0_i32_0 : i32, i32
  }
  func.func @transform_2(%arg0: i32) -> (i32, i32) {
    %c0_i32 = arith.constant 0 : i32
    %c0_i32_0 = arith.constant 0 : i32
    %c0_i32_1 = arith.constant 0 : i32
    return %c0_i32, %c0_i32_0 : i32, i32
  }
  func.func @transform_3(%arg0: i32) -> (i32, i32) {
    %c0_i32 = arith.constant 0 : i32
    %c0_i32_0 = arith.constant 0 : i32
    %c0_i32_1 = arith.constant 0 : i32
    return %c0_i32, %c0_i32_0 : i32, i32
  }
  func.func @transform_4(%arg0: i32) -> (i32, i32) {
    %c0_i32 = arith.constant 0 : i32
    %c0_i32_0 = arith.constant 0 : i32
    %c0_i32_1 = arith.constant 0 : i32
    return %c0_i32, %c0_i32_0 : i32, i32
  }
  func.func @transform_5(%arg0: i32) -> (i32, i32) {
    %c0_i32 = arith.constant 0 : i32
    %c0_i32_0 = arith.constant 0 : i32
    %c0_i32_1 = arith.constant 0 : i32
    return %c0_i32, %c0_i32_0 : i32, i32
  }
  func.func @transform_6(%arg0: i32) -> (i32, i32) {
    %c0_i32 = arith.constant 0 : i32
    %c0_i32_0 = arith.constant 0 : i32
    %c0_i32_1 = arith.constant 0 : i32
    return %c0_i32, %c0_i32_0 : i32, i32
  }
  func.func @transform_7(%arg0: i32) -> (i32, i32) {
    %c0_i32 = arith.constant 0 : i32
    %c0_i32_0 = arith.constant 0 : i32
    return %c0_i32, %arg0 : i32, i32
  }
}

module attributes {stable_mosaic.version = 11 : i64} {
  func.func @_mlp_group_kernel(%arg0: i32, %arg1: memref<128x8xf32, #tpu.memory_space<vmem>>, %arg2: memref<128x128xf32, #tpu.memory_space<vmem>>, %arg3: memref<128x1xf32, #tpu.memory_space<vmem>>, %arg4: memref<128x128xf32, #tpu.memory_space<vmem>>, %arg5: memref<128x1xf32, #tpu.memory_space<vmem>>, %arg6: memref<1x128xf32, #tpu.memory_space<vmem>>, %arg7: memref<1x1xf32, #tpu.memory_space<vmem>>, %arg8: memref<1x8xf32, #tpu.memory_space<vmem>>) attributes {dimension_semantics = [#tpu.dimension_semantics<parallel>], iteration_bounds = array<i64: 1>, scalar_prefetch = 0 : i64, scratch_operands = 0 : i64, tpu.core_type = #tpu.core_type<tc>, window_params = [{transform_indices = @transform_0, window_bounds = array<i64: 128, 8>}, {pipeline_mode = #tpu.pipeline_mode<synchronous>, transform_indices = @transform_1, window_bounds = array<i64: 128, 128>}, {pipeline_mode = #tpu.pipeline_mode<synchronous>, transform_indices = @transform_2, window_bounds = array<i64: 128, 1>}, {pipeline_mode = #tpu.pipeline_mode<synchronous>, transform_indices = @transform_3, window_bounds = array<i64: 128, 128>}, {pipeline_mode = #tpu.pipeline_mode<synchronous>, transform_indices = @transform_4, window_bounds = array<i64: 128, 1>}, {pipeline_mode = #tpu.pipeline_mode<synchronous>, transform_indices = @transform_5, window_bounds = array<i64: 1, 128>}, {pipeline_mode = #tpu.pipeline_mode<synchronous>, transform_indices = @transform_6, window_bounds = array<i64: 1, 1>}, {transform_indices = @transform_7, window_bounds = array<i64: 1, 8>}]} {
    %c0 = arith.constant 0 : index
    %c0_0 = arith.constant 0 : index
    %0 = vector.load %arg1[%c0, %c0_0] : memref<128x8xf32, #tpu.memory_space<vmem>>, vector<128x8xf32>
    %c0_1 = arith.constant 0 : index
    %c0_2 = arith.constant 0 : index
    %1 = vector.load %arg2[%c0_1, %c0_2] : memref<128x128xf32, #tpu.memory_space<vmem>>, vector<128x128xf32>
    %c0_3 = arith.constant 0 : index
    %c0_4 = arith.constant 0 : index
    %2 = vector.load %arg3[%c0_3, %c0_4] : memref<128x1xf32, #tpu.memory_space<vmem>>, vector<128x1xf32>
    %cst = arith.constant dense<0.000000e+00> : vector<128x8xf32>
    %3 = tpu.matmul %1, %0, %cst {dimension_numbers = #tpu.dot_dimension_numbers<[1], [0], [0], [1], [0, 0, 1, 1], [], []>} : vector<128x128xf32>, vector<128x8xf32>, vector<128x8xf32> -> vector<128x8xf32>
    %4 = vector.broadcast %2 : vector<128x1xf32> to vector<128x8xf32>
    %5 = arith.addf %3, %4 : vector<128x8xf32>
    %cst_5 = arith.constant 0.000000e+00 : f32
    %6 = vector.broadcast %cst_5 : f32 to vector<128x8xf32>
    %7 = arith.maximumf %5, %6 : vector<128x8xf32>
    %c0_6 = arith.constant 0 : index
    %c0_7 = arith.constant 0 : index
    %8 = vector.load %arg4[%c0_6, %c0_7] : memref<128x128xf32, #tpu.memory_space<vmem>>, vector<128x128xf32>
    %c0_8 = arith.constant 0 : index
    %c0_9 = arith.constant 0 : index
    %9 = vector.load %arg5[%c0_8, %c0_9] : memref<128x1xf32, #tpu.memory_space<vmem>>, vector<128x1xf32>
    %cst_10 = arith.constant dense<0.000000e+00> : vector<128x8xf32>
    %10 = tpu.matmul %8, %7, %cst_10 {dimension_numbers = #tpu.dot_dimension_numbers<[1], [0], [0], [1], [0, 0, 1, 1], [], []>} : vector<128x128xf32>, vector<128x8xf32>, vector<128x8xf32> -> vector<128x8xf32>
    %11 = vector.broadcast %9 : vector<128x1xf32> to vector<128x8xf32>
    %12 = arith.addf %10, %11 : vector<128x8xf32>
    %cst_11 = arith.constant 0.000000e+00 : f32
    %13 = vector.broadcast %cst_11 : f32 to vector<128x8xf32>
    %14 = arith.maximumf %12, %13 : vector<128x8xf32>
    %c0_12 = arith.constant 0 : index
    %c0_13 = arith.constant 0 : index
    %15 = vector.load %arg6[%c0_12, %c0_13] : memref<1x128xf32, #tpu.memory_space<vmem>>, vector<1x128xf32>
    %c0_14 = arith.constant 0 : index
    %c0_15 = arith.constant 0 : index
    %16 = vector.load %arg7[%c0_14, %c0_15] : memref<1x1xf32, #tpu.memory_space<vmem>>, vector<1x1xf32>
    %cst_16 = arith.constant dense<0.000000e+00> : vector<1x8xf32>
    %17 = tpu.matmul %15, %14, %cst_16 {dimension_numbers = #tpu.dot_dimension_numbers<[1], [0], [0], [1], [0, 0, 1, 1], [], []>} : vector<1x128xf32>, vector<128x8xf32>, vector<1x8xf32> -> vector<1x8xf32>
    %18 = vector.broadcast %16 : vector<1x1xf32> to vector<1x8xf32>
    %19 = arith.addf %17, %18 : vector<1x8xf32>
    %c0_17 = arith.constant 0 : index
    %c0_18 = arith.constant 0 : index
    %20 = vector.load %arg8[%c0_17, %c0_18] : memref<1x8xf32, #tpu.memory_space<vmem>>, vector<1x8xf32>
    tpu.vector_store %arg8[%c0_17, %c0_18], %19 {strides = array<i32>} : memref<1x8xf32, #tpu.memory_space<vmem>>, vector<1x8xf32>,
    return
  }
  func.func @transform_0(%arg0: i32) -> (i32, i32) {
    %c0_i32 = arith.constant 0 : i32
    %c0_i32_0 = arith.constant 0 : i32
    return %c0_i32, %arg0 : i32, i32
  }
  func.func @transform_1(%arg0: i32) -> (i32, i32) {
    %c0_i32 = arith.constant 0 : i32
    %c0_i32_0 = arith.constant 0 : i32
    %c0_i32_1 = arith.constant 0 : i32
    return %c0_i32, %c0_i32_0 : i32, i32
  }
  func.func @transform_2(%arg0: i32) -> (i32, i32) {
    %c0_i32 = arith.constant 0 : i32
    %c0_i32_0 = arith.constant 0 : i32
    %c0_i32_1 = arith.constant 0 : i32
    return %c0_i32, %c0_i32_0 : i32, i32
  }
  func.func @transform_3(%arg0: i32) -> (i32, i32) {
    %c0_i32 = arith.constant 0 : i32
    %c0_i32_0 = arith.constant 0 : i32
    %c0_i32_1 = arith.constant 0 : i32
    return %c0_i32, %c0_i32_0 : i32, i32
  }
  func.func @transform_4(%arg0: i32) -> (i32, i32) {
    %c0_i32 = arith.constant 0 : i32
    %c0_i32_0 = arith.constant 0 : i32
    %c0_i32_1 = arith.constant 0 : i32
    return %c0_i32, %c0_i32_0 : i32, i32
  }
  func.func @transform_5(%arg0: i32) -> (i32, i32) {
    %c0_i32 = arith.constant 0 : i32
    %c0_i32_0 = arith.constant 0 : i32
    %c0_i32_1 = arith.constant 0 : i32
    return %c0_i32, %c0_i32_0 : i32, i32
  }
  func.func @transform_6(%arg0: i32) -> (i32, i32) {
    %c0_i32 = arith.constant 0 : i32
    %c0_i32_0 = arith.constant 0 : i32
    %c0_i32_1 = arith.constant 0 : i32
    return %c0_i32, %c0_i32_0 : i32, i32
  }
  func.func @transform_7(%arg0: i32) -> (i32, i32) {
    %c0_i32 = arith.constant 0 : i32
    %c0_i32_0 = arith.constant 0 : i32
    return %c0_i32, %arg0 : i32, i32
  }
}

</mosaic_0001>

<bundles_post_ra>
// kernel: tpu_custom_call.1
= control target key start
LH: loop header
LB: loop body
LE: loop exit
PB: predicated region body
PF: predicated region fallthrough
CT: control target
= control target key end

     0   :  { %s1346_s0 = inlined_call_operand.vmem [shape: f32[128,8], index: 0, kind: input, shape index: {}]   ;;  %s1347_s1 = inlined_call_operand.vmem [shape: f32[128,128], index: 1, kind: input, shape index: {}]   ;;  %s1348_s2 = inlined_call_operand.vmem [shape: f32[128,1], index: 2, kind: input, shape index: {}]   ;;  %s1349_s3 = inlined_call_operand.vmem [shape: f32[128,128], index: 3, kind: input, shape index: {}]   ;;  %s1350_s4 = inlined_call_operand.vmem [shape: f32[128,1], index: 4, kind: input, shape index: {}]   ;;  %s1351_s5 = inlined_call_operand.vmem [shape: f32[1,128], index: 5, kind: input, shape index: {}]   ;;  %s1352_s6 = inlined_call_operand.<no memory space> [shape: f32[1,1], index: 6, kind: input, shape index: {}]   ;;  %s1353_s7 = inlined_call_operand.hbm [shape: f32[1,8], index: 7, kind: output, shape index: {}]  }
   0x1   :  { %v12_v0 = vstv %s1352_s6 }
   0x2   :  { %13 = vst [vmem:[#allocation2] sm:$0x1] %v12_v0 }
   0x3   :  { %v29_v1 = vld [vmem:[%s1346_s0] sm:$0xff]  ;;  %v30_v2 = vld [vmem:[%s1346_s0 + $0x8] sm:$0xff]  ;;  %v31_v3 = vld [vmem:[%s1346_s0 + $0x10] sm:$0xff]  ;;  %v1035_v6 = vmov 0  }
   0x4   :  { %v916_v4 = vpack.c.bf16 %v30_v2, %v29_v1  ;;  %v32_v5 = vld [vmem:[%s1346_s0 + $0x18] sm:$0xff]  ;;  %1009 = vset.pattern.permute.xlu0 %v1035_v6  ;;  %1010 = vset.pattern.permute.xlu1 %v1035_v6  ;;  %v33_v8 = vld [vmem:[%s1346_s0 + $0x20] sm:$0xff]  ;;  %v34_v9 = vld [vmem:[%s1346_s0 + $0x28] sm:$0xff] }
   0x5   :  { %v920_v7 = vpack.c.bf16 %v32_v5, %v31_v3  ;;  %v924_v10 = vpack.c.bf16 %v34_v9, %v33_v8  ;;  %v45_v11 = vld [vmem:[%s1347_s1] sm:$0xff]  ;;  %v35_v12 = vld [vmem:[%s1346_s0 + $0x30] sm:$0xff]  ;;  %v36_v13 = vld [vmem:[%s1346_s0 + $0x38] sm:$0xff] }
   0x6   :  { %917 = vmatprep.subr.bf16.mxu0 %v916_v4  ;;  %801 = vmatprep.mubr.f32.mxu0 %v45_v11  ;;  %v61_v14 = vld [vmem:[%s1348_s2] sm:$0xff]  ;;  %v928_v15 = vpack.c.bf16 %v36_v13, %v35_v12  ;;  %v38_v17 = vld [vmem:[%s1346_s0 + $0x48] sm:$0xff]  ;;  %v63_v19 = vld [vmem:[%s1348_s2 + $0x10] sm:$0xff] }
   0x7   :  { %919 = vmatpush3.bf16.msra.mxu0 %v916_v4  ;;  %v37_v16 = vld [vmem:[%s1346_s0 + $0x40] sm:$0xff]  ;;  %79 = vperm.xlu0 %1009, %v61_v14   ;;  %v62_v18 = vld [vmem:[%s1348_s2 + $0x8] sm:$0xff]  ;;  %v64_v20 = vld [vmem:[%s1348_s2 + $0x18] sm:$0xff] }
   0x8   :  { %921 = vmatprep.subr.bf16.mxu0 %v920_v7  ;;  %89 = vperm.xlu1 %1010, %v63_v19   ;;  %v932_v21 = vpack.c.bf16 %v38_v17, %v37_v16  ;;  %v39_v22 = vld [vmem:[%s1346_s0 + $0x50] sm:$0xff]  ;;  %v40_v23 = vld [vmem:[%s1346_s0 + $0x58] sm:$0xff]  ;;  %v65_v24 = vld [vmem:[%s1348_s2 + $0x20] sm:$0xff] }
   0x9   :  { %v66_v25 = vld [vmem:[%s1348_s2 + $0x28] sm:$0xff]  ;;  %v936_v26 = vpack.c.bf16 %v40_v23, %v39_v22  ;;  %v41_v27 = vld [vmem:[%s1346_s0 + $0x60] sm:$0xff]  ;;  %v67_v29 = vld [vmem:[%s1348_s2 + $0x30] sm:$0xff] }
   0xa   :  { %v42_v28 = vld [vmem:[%s1346_s0 + $0x68] sm:$0xff]  ;;  %v68_v30 = vld [vmem:[%s1348_s2 + $0x38] sm:$0xff] }
   0xb   :  { %923 = vmatpush3.bf16.msra.mxu0 %v920_v7  ;;  %84 = vperm.xlu0 %1009, %v62_v18   ;;  %v940_v31 = vpack.c.bf16 %v42_v28, %v41_v27 }
   0xc   :  { %925 = vmatprep.subr.bf16.mxu0 %v924_v10  ;;  %94 = vperm.xlu1 %1010, %v64_v20  }
   0xf   :  { %927 = vmatpush3.bf16.msra.mxu0 %v924_v10  ;;  %99 = vperm.xlu0 %1009, %v65_v24  }
  0x10   :  { %929 = vmatprep.subr.bf16.mxu0 %v928_v15  ;;  %104 = vperm.xlu1 %1010, %v66_v25  }
  0x13   :  { %931 = vmatpush3.bf16.msra.mxu0 %v928_v15  ;;  %109 = vperm.xlu0 %1009, %v67_v29  }
  0x14   :  { %933 = vmatprep.subr.bf16.mxu0 %v932_v21 }
  0x17   :  { %935 = vmatpush3.bf16.msra.mxu0 %v932_v21 }
  0x18   :  { %937 = vmatprep.subr.bf16.mxu0 %v936_v26 }
  0x19   :  { %14 = vsyncpa [#allocation4], 0  ;;  %v43_v32 = vld [vmem:[%s1346_s0 + $0x70] sm:$0xff]  ;;  %v44_v33 = vld [vmem:[%s1346_s0 + $0x78] sm:$0xff]  ;;  %114 = vperm.xlu1 %1010, %v68_v30   ;;  %vm1037_vm0 = vmmov 0   ;;  %s1039_s9 = smov [#allocation3]  }
  0x1a   :  { %v69_v34 = vld [vmem:[%s1348_s2 + $0x40] sm:$0xff]  ;;  %v70_v35 = vld [vmem:[%s1348_s2 + $0x48] sm:$0xff]  ;;  %v944_v36 = vpack.c.bf16 %v44_v33, %v43_v32  ;;  %v71_v37 = vld [vmem:[%s1348_s2 + $0x50] sm:$0xff]  ;;  %vm672_vm1 = vcmask 57344  }
  0x1b   :  { %939 = vmatpush3.bf16.msra.mxu0 %v936_v26  ;;  %119 = vperm.xlu0 %1009, %v69_v34   ;;  %v72_v38 = vld [vmem:[%s1348_s2 + $0x58] sm:$0xff]  ;;  %v73_v39 = vld [vmem:[%s1348_s2 + $0x60] sm:$0xff]  ;;  %v46_v40 = vld [vmem:[%s1347_s1 + $0x8] sm:$0xff] }
  0x1c   :  { %941 = vmatprep.subr.bf16.mxu0 %v940_v31  ;;  %v74_v41 = vld [vmem:[%s1348_s2 + $0x68] sm:$0xff]  ;;  %v47_v42 = vld [vmem:[%s1347_s1 + $0x10] sm:$0xff]  ;;  %v48_v44 = vld [vmem:[%s1347_s1 + $0x18] sm:$0xff] }
  0x1d   :  { %124 = vperm.xlu1 %1010, %v70_v35   ;;  %v75_v43 = vld [vmem:[%s1348_s2 + $0x70] sm:$0xff]  ;;  %v76_v45 = vld [vmem:[%s1348_s2 + $0x78] sm:$0xff]  ;;  %v49_v46 = vld [vmem:[%s1347_s1 + $0x20] sm:$0xff]  ;;  %s680_s2 = sshll.u32 %s1039_s9, 4  ;;  %s681_s2 = int_to_ptr.vmem [resolvable:$true] %s680_s2 }
  0x1e   :  { %v334_v47 = vld [vmem:[%s1350_s4] sm:$0xff]  ;;  %v50_v48 = vld [vmem:[%s1347_s1 + $0x28] sm:$0xff]  ;;  %v51_v50 = vld [vmem:[%s1347_s1 + $0x30] sm:$0xff]  ;;  %s1011_s10 = scalar_lea.vmem %s681_s2, 16  ;;  %s1015_s0 = scalar_lea.vmem %s681_s2, 32 }
  0x1f   :  { %943 = vmatpush3.bf16.msra.mxu0 %v940_v31  ;;  %129 = vperm.xlu0 %1009, %v71_v37   ;;  %v335_v49 = vld [vmem:[%s1350_s4 + $0x8] sm:$0xff]  ;;  %v336_v51 = vld [vmem:[%s1350_s4 + $0x10] sm:$0xff]  ;;  %v52_v52 = vld [vmem:[%s1347_s1 + $0x38] sm:$0xff]  ;;  %p1012_p0 = scmp.ne.s32.totalorder %s681_s2, %s1011_s10  ;;  %p1016_p1 = scmp.lt.s32.totalorder %s681_s2, %s681_s2 }
  0x20   :  { %945 = vmatprep.subr.bf16.mxu0 %v944_v36  ;;  %v337_v53 = vld [vmem:[%s1350_s4 + $0x18] sm:$0xff]  ;;  %v53_v54 = vld [vmem:[%s1347_s1 + $0x40] sm:$0xff]  ;;  %v54_v56 = vld [vmem:[%s1347_s1 + $0x48] sm:$0xff]  ;;  %p1017_p2 = scmp.lt.s32.totalorder %s1015_s0, %s1011_s10 }
  0x21   :  { %134 = vperm.xlu1 %1010, %v72_v38   ;;  %v338_v55 = vld [vmem:[%s1350_s4 + $0x20] sm:$0xff]  ;;  %v339_v57 = vld [vmem:[%s1350_s4 + $0x28] sm:$0xff]  ;;  %v55_v58 = vld [vmem:[%s1347_s1 + $0x50] sm:$0xff] }
  0x22   :  { %v340_v59 = vld [vmem:[%s1350_s4 + $0x30] sm:$0xff]  ;;  %v56_v60 = vld [vmem:[%s1347_s1 + $0x58] sm:$0xff]  ;;  %v57_v62 = vld [vmem:[%s1347_s1 + $0x60] sm:$0xff]  ;;  %p1018_p3 = por %p1017_p2, %p1016_p1 }
  0x23   :  { %947 = vmatpush3.bf16.msra.mxu0 %v944_v36  ;;  %139 = vperm.xlu0 %1009, %v73_v39   ;;  %v341_v61 = vld [vmem:[%s1350_s4 + $0x38] sm:$0xff]  ;;  %v342_v63 = vld [vmem:[%s1350_s4 + $0x40] sm:$0xff]  ;;  %v58_v0 = vld [vmem:[%s1347_s1 + $0x68] sm:$0xff] }
  0x24   :  { %v343_v1 = vld [vmem:[%s1350_s4 + $0x48] sm:$0xff]  ;;  %v59_v2 = vld [vmem:[%s1347_s1 + $0x70] sm:$0xff]  ;;  %v60_v4 = vld [vmem:[%s1347_s1 + $0x78] sm:$0xff]  ;;  %p1019_p4 = pnand %p1018_p3, %p1012_p0 }
  0x25   :  { %144 = vperm.xlu1 %1010, %v74_v41   ;;  %v344_v3 = vld [vmem:[%s1350_s4 + $0x50] sm:$0xff]  ;;  %v345_v5 = vld [vmem:[%s1350_s4 + $0x58] sm:$0xff]  ;;  %v346_v6 = vld [vmem:[%s1350_s4 + $0x60] sm:$0xff] }
  0x26   :  { %802 = vmatmul.mubr.f32.vlgmr.msra.gmra.mrb[0].mxu0 %v46_v40  ;;  %v347_v7 = vld [vmem:[%s1350_s4 + $0x68] sm:$0xff]  ;;  %v348_v8 = vld [vmem:[%s1350_s4 + $0x70] sm:$0xff]  ;;  %v349_v9 = vld [vmem:[%s1350_s4 + $0x78] sm:$0xff] }
  0x27   :  { %804 = vmatprep.mubr.f32.mxu0 %v47_v42  ;;  %149 = vperm.xlu0 %1009, %v75_v43   ;;  %v592_v10 = vld [vmem:[#allocation2] sm:$0x1] }
  0x28   :  { %v318_v11 = vld [vmem:[%s1349_s3] sm:$0xff] }
  0x29   :  { %154 = vperm.xlu1 %1010, %v76_v45   ;;  %857 = vmatprep.mubr.f32.mxu1 %v318_v11 }
  0x2a   :  { %805 = vmatmul.mubr.f32.gmra.mrb[2].mxu0 %v48_v44 }
  0x2b   :  { %807 = vmatprep.mubr.f32.mxu0 %v49_v46  ;;  %352 = vperm.xlu0 %1009, %v334_v47  }
  0x2d   :  { %357 = vperm.xlu1 %1010, %v335_v49  }
  0x2e   :  { %808 = vmatmul.mubr.f32.gmra.mrb[4].mxu0 %v50_v48 }
  0x2f   :  { %810 = vmatprep.mubr.f32.mxu0 %v51_v50  ;;  %362 = vperm.xlu0 %1009, %v336_v51  }
  0x31   :  { %367 = vperm.xlu1 %1010, %v337_v53  }
  0x32   :  { %811 = vmatmul.mubr.f32.gmra.mrb[6].mxu0 %v52_v52 }
  0x33   :  { %813 = vmatprep.mubr.f32.mxu0 %v53_v54  ;;  %372 = vperm.xlu0 %1009, %v338_v55  }
  0x35   :  { %377 = vperm.xlu1 %1010, %v339_v57  }
  0x36   :  { %814 = vmatmul.mubr.f32.gmra.mrb[8].mxu0 %v54_v56 }
  0x37   :  { %816 = vmatprep.mubr.f32.mxu0 %v55_v58  ;;  %382 = vperm.xlu0 %1009, %v340_v59  }
  0x39   :  { %387 = vperm.xlu1 %1010, %v341_v61  }
  0x3a   :  { %817 = vmatmul.mubr.f32.gmra.mrb[10].mxu0 %v56_v60 }
  0x3b   :  { %819 = vmatprep.mubr.f32.mxu0 %v57_v62  ;;  %392 = vperm.xlu0 %1009, %v342_v63  }
  0x3d   :  { %397 = vperm.xlu1 %1010, %v343_v1  }
  0x3e   :  { %820 = vmatmul.mubr.f32.gmra.mrb[12].mxu0 %v58_v0 }
  0x3f   :  { %822 = vmatprep.mubr.f32.mxu0 %v59_v2  ;;  %402 = vperm.xlu0 %1009, %v344_v3  }
  0x41   :  { %407 = vperm.xlu1 %1010, %v345_v5  }
  0x42   :  { %823 = vmatmul.mubr.f32.gmra.mrb[14].mxu0 %v60_v4 }
  0x43   :  { %412 = vperm.xlu0 %1009, %v346_v6  }
  0x45   :  { %417 = vperm.xlu1 %1010, %v347_v7  }
  0x47   :  { %422 = vperm.xlu0 %1009, %v348_v8  }
  0x49   :  { %427 = vperm.xlu1 %1010, %v349_v9  }
  0x4b   :  { %595 = vperm.xlu0 %1009, %v592_v10  }
  0x86   :  { %v80_v13 = vpop.permute.xlu0 %79 }
  0x87   :  { %v90_v12 = vpop.permute.xlu1 %89 }
  0x8a   :  { %v85_v15 = vpop.permute.xlu0 %84 }
  0x8b   :  { %v95_v14 = vpop.permute.xlu1 %94 }
  0x8e   :  { %v100_v17 = vpop.permute.xlu0 %99 }
  0x8f   :  { %v105_v16 = vpop.permute.xlu1 %104 }
  0x92   :  { %v110_v26 = vpop.permute.xlu0 %109 }
  0x98   :  { %v115_v23 = vpop.permute.xlu1 %114 }
  0x9a   :  { %v120_v39 = vpop.permute.xlu0 %119 }
  0x9c   :  { %v125_v36 = vpop.permute.xlu1 %124 }
  0x9e   :  { %v130_v51 = vpop.permute.xlu0 %129 }
  0xa0   :  { %v135_v48 = vpop.permute.xlu1 %134 }
  0xa2   :  { %v140_v0 = vpop.permute.xlu0 %139 }
  0xa4   :  { %v145_v61 = vpop.permute.xlu1 %144 }
  0xa8   :  { %v155_v9 = vpop.permute.xlu1 %154 }
  0xf9   :  { %v803_v18 = vpop.f32.mrb[0].mxu0 }
  0xfa   :  { %v229_v19 = vadd.f32 %v803_v18, %v85_v15  ;;  %v223_v20 = vpop.f32.mrb[1].mxu0 }
  0xfb   :  { %v224_v21 = vadd.f32 %v223_v20, %v80_v13  ;;  %v319_v20 = vld [vmem:[%s1349_s3 + $0x8] sm:$0xff] }
  0xfc   :  { %v303_v22 = vmax.f32 %v229_v19, 0.0 }
  0xfd   :  { %v302_v24 = vmax.f32 %v224_v21, 0.0  ;;  %v806_v25 = vpop.f32.mrb[2].mxu0  ;;  %v320_v21 = vld [vmem:[%s1349_s3 + $0x10] sm:$0xff] }
  0xfe   :  { %v239_v27 = vadd.f32 %v806_v25, %v95_v14  ;;  %v233_v28 = vpop.f32.mrb[3].mxu0  ;;  %v324_v25 = vld [vmem:[%s1349_s3 + $0x30] sm:$0xff] }
  0xff   :  { %v234_v29 = vadd.f32 %v233_v28, %v90_v12  ;;  %v948_v30 = vpack.c.bf16 %v303_v22, %v302_v24  ;;  %v150_v12 = vpop.permute.xlu0 %149  ;;  %v321_v22 = vld [vmem:[%s1349_s3 + $0x18] sm:$0xff]  ;;  %v323_v24 = vld [vmem:[%s1349_s3 + $0x28] sm:$0xff] }
 0x100   :  { %v305_v31 = vmax.f32 %v239_v27, 0.0  ;;  %v326_v27 = vld [vmem:[%s1349_s3 + $0x40] sm:$0xff]  ;;  %v327_v28 = vld [vmem:[%s1349_s3 + $0x48] sm:$0xff] }
 0x101   :  { %v304_v32 = vmax.f32 %v234_v29, 0.0  ;;  %v809_v33 = vpop.f32.mrb[4].mxu0  ;;  %949 = vmatprep.subr.bf16.mxu1 %v948_v30  ;;  %v328_v29 = vld [vmem:[%s1349_s3 + $0x50] sm:$0xff] }
 0x102   :  { %v249_v34 = vadd.f32 %v809_v33, %v105_v16  ;;  %v243_v35 = vpop.f32.mrb[5].mxu0  ;;  %951 = vmatpush3.bf16.msra.mxu1 %v948_v30  ;;  %v329_v30 = vld [vmem:[%s1349_s3 + $0x58] sm:$0xff]  ;;  %v332_v33 = vld [vmem:[%s1349_s3 + $0x70] sm:$0xff] }
 0x103   :  { %v952_v37 = vpack.c.bf16 %v305_v31, %v304_v32  ;;  %v244_v38 = vadd.f32 %v243_v35, %v100_v17  ;;  %v330_v31 = vld [vmem:[%s1349_s3 + $0x60] sm:$0xff]  ;;  %v331_v32 = vld [vmem:[%s1349_s3 + $0x68] sm:$0xff]  ;;  %v1036_v35 = vmov 0.0|0.0  }
 0x104   :  { %v307_v40 = vmax.f32 %v249_v34, 0.0  ;;  %v333_v34 = vld [vmem:[%s1349_s3 + $0x78] sm:$0xff]  ;;  %980 = vmatprep.subr.bf16.mxu0 %v1036_v35 }
 0x105   :  { %v306_v41 = vmax.f32 %v244_v38, 0.0  ;;  %v812_v42 = vpop.f32.mrb[6].mxu0  ;;  %953 = vmatprep.subr.bf16.mxu1 %v952_v37  ;;  %v353_v38 = vpop.permute.xlu0 %352 }
 0x106   :  { %v259_v43 = vadd.f32 %v812_v42, %v115_v23  ;;  %v253_v44 = vpop.f32.mrb[7].mxu0  ;;  %955 = vmatpush3.bf16.msra.mxu1 %v952_v37  ;;  %v322_v23 = vld [vmem:[%s1349_s3 + $0x20] sm:$0xff]  ;;  %v358_v37 = vpop.permute.xlu1 %357 }
 0x107   :  { %v956_v45 = vpack.c.bf16 %v307_v40, %v306_v41  ;;  %v254_v46 = vadd.f32 %v253_v44, %v110_v26  ;;  %v325_v26 = vld [vmem:[%s1349_s3 + $0x38] sm:$0xff] }
 0x108   :  { %v309_v47 = vmax.f32 %v259_v43, 0.0 }
 0x109   :  { %v308_v49 = vmax.f32 %v254_v46, 0.0  ;;  %v815_v50 = vpop.f32.mrb[8].mxu0  ;;  %957 = vmatprep.subr.bf16.mxu1 %v956_v45  ;;  %v363_v40 = vpop.permute.xlu0 %362 }
 0x10a   :  { %v269_v52 = vadd.f32 %v815_v50, %v125_v36  ;;  %v263_v53 = vpop.f32.mrb[9].mxu0  ;;  %959 = vmatpush3.bf16.msra.mxu1 %v956_v45  ;;  %v1038_v36 = vmov 0.0  }
 0x10b   :  { %v960_v54 = vpack.c.bf16 %v309_v47, %v308_v49  ;;  %v264_v55 = vadd.f32 %v263_v53, %v120_v39  ;;  %913 = vmatprep.mubr.msk.f32.mxu0 %vm1037_vm0, %v1038_v36  ;;  %v368_v39 = vpop.permute.xlu1 %367 }
 0x10c   :  { %v311_v56 = vmax.f32 %v269_v52, 0.0 }
 0x10d   :  { %v310_v57 = vmax.f32 %v264_v55, 0.0  ;;  %v818_v58 = vpop.f32.mrb[10].mxu0  ;;  %961 = vmatprep.subr.bf16.mxu1 %v960_v54  ;;  %v373_v42 = vpop.permute.xlu0 %372 }
 0x10e   :  { %v279_v59 = vadd.f32 %v818_v58, %v135_v48  ;;  %v273_v60 = vpop.f32.mrb[11].mxu0  ;;  %963 = vmatpush3.bf16.msra.mxu1 %v960_v54 }
 0x10f   :  { %v964_v62 = vpack.c.bf16 %v311_v56, %v310_v57  ;;  %v274_v63 = vadd.f32 %v273_v60, %v130_v51  ;;  %v378_v41 = vpop.permute.xlu1 %377 }
 0x110   :  { %v313_v1 = vmax.f32 %v279_v59, 0.0 }
 0x111   :  { %v312_v2 = vmax.f32 %v274_v63, 0.0  ;;  %v821_v3 = vpop.f32.mrb[12].mxu0  ;;  %965 = vmatprep.subr.bf16.mxu1 %v964_v62  ;;  %v383_v51 = vpop.permute.xlu0 %382 }
 0x112   :  { %v289_v4 = vadd.f32 %v821_v3, %v145_v61  ;;  %v283_v5 = vpop.f32.mrb[13].mxu0  ;;  %967 = vmatpush3.bf16.msra.mxu1 %v964_v62 }
 0x113   :  { %v968_v6 = vpack.c.bf16 %v313_v1, %v312_v2  ;;  %v284_v7 = vadd.f32 %v283_v5, %v140_v0  ;;  %v388_v48 = vpop.permute.xlu1 %387 }
 0x114   :  { %v315_v8 = vmax.f32 %v289_v4, 0.0 }
 0x115   :  { %v314_v10 = vmax.f32 %v284_v7, 0.0  ;;  %v824_v11 = vpop.f32.mrb[14].mxu0  ;;  %969 = vmatprep.subr.bf16.mxu1 %v968_v6  ;;  %v393_v0 = vpop.permute.xlu0 %392 }
 0x116   :  { %v299_v13 = vadd.f32 %v824_v11, %v155_v9  ;;  %v293_v14 = vpop.f32.mrb[15].mxu0  ;;  %971 = vmatpush3.bf16.msra.mxu1 %v968_v6 }
 0x117   :  { %v972_v15 = vpack.c.bf16 %v315_v8, %v314_v10  ;;  %v294_v16 = vadd.f32 %v293_v14, %v150_v12  ;;  %v398_v61 = vpop.permute.xlu1 %397 }
 0x118   :  { %v317_v17 = vmax.f32 %v299_v13, 0.0 }
 0x119   :  { %v316_v18 = vmax.f32 %v294_v16, 0.0  ;;  %973 = vmatprep.subr.bf16.mxu1 %v972_v15  ;;  %v403_v12 = vpop.permute.xlu0 %402 }
 0x11a   :  { %975 = vmatpush3.bf16.msra.mxu1 %v972_v15 }
 0x11b   :  { %v976_v19 = vpack.c.bf16 %v317_v17, %v316_v18  ;;  %v408_v9 = vpop.permute.xlu1 %407 }
 0x11d   :  { %977 = vmatprep.subr.bf16.mxu1 %v976_v19 }
 0x11e   :  { %979 = vmatpush3.bf16.msra.mxu1 %v976_v19 }
 0x121   :  { %858 = vmatmul.mubr.f32.vlgmr.msra.gmra.mrb[0].mxu1 %v319_v20 }
 0x122   :  { %860 = vmatprep.mubr.f32.mxu1 %v320_v21 }
 0x125   :  { %861 = vmatmul.mubr.f32.gmra.mrb[2].mxu1 %v321_v22  ;;  %v418_v22 = vpop.permute.xlu1 %417 }
 0x126   :  { %863 = vmatprep.mubr.f32.mxu1 %v322_v23 }
 0x129   :  { %864 = vmatmul.mubr.f32.gmra.mrb[4].mxu1 %v323_v24 }
 0x12a   :  { %866 = vmatprep.mubr.f32.mxu1 %v324_v25  ;;  %v413_v25 = vpop.permute.xlu0 %412 }
 0x12d   :  { %867 = vmatmul.mubr.f32.gmra.mrb[6].mxu1 %v325_v26 }
 0x12e   :  { %869 = vmatprep.mubr.f32.mxu1 %v326_v27 }
 0x131   :  { %870 = vmatmul.mubr.f32.gmra.mrb[8].mxu1 %v327_v28 }
 0x132   :  { %872 = vmatprep.mubr.f32.mxu1 %v328_v29 }
 0x135   :  { %873 = vmatmul.mubr.f32.gmra.mrb[10].mxu1 %v329_v30 }
 0x136   :  { %875 = vmatprep.mubr.f32.mxu1 %v330_v31 }
 0x139   :  { %876 = vmatmul.mubr.f32.gmra.mrb[12].mxu1 %v331_v32 }
 0x13a   :  { %878 = vmatprep.mubr.f32.mxu1 %v332_v33 }
 0x13d   :  { %879 = vmatmul.mubr.f32.gmra.mrb[14].mxu1 %v333_v34  ;;  %v428_v34 = vpop.permute.xlu1 %427 }
 0x1f4   :  { %v859_v43 = vpop.f32.mrb[0].mxu1 }
 0x1f5   :  { %v502_v44 = vadd.f32 %v859_v43, %v358_v37  ;;  %v496_v45 = vpop.f32.mrb[1].mxu1 }
 0x1f6   :  { %v497_v46 = vadd.f32 %v496_v45, %v353_v38  ;;  %v423_v38 = vpop.permute.xlu0 %422 }
 0x1f7   :  { %v576_v47 = vmax.f32 %v502_v44, 0.0 }
 0x1f8   :  { %v575_v49 = vmax.f32 %v497_v46, 0.0  ;;  %v862_v50 = vpop.f32.mrb[2].mxu1  ;;  %v591_v46 = vld [vmem:[%s1351_s5] sm:$0x1] }
 0x1f9   :  { %v512_v52 = vadd.f32 %v862_v50, %v368_v39  ;;  %v506_v53 = vpop.f32.mrb[3].mxu1 }
 0x1fa   :  { %v981_v54 = vpack.c.bf16 %v576_v47, %v575_v49  ;;  %v507_v55 = vadd.f32 %v506_v53, %v363_v40  ;;  %v598_v47 = vlaneseq  ;;  %v596_v50 = vpop.permute.xlu0 %595 }
 0x1fb   :  { %v578_v56 = vmax.f32 %v512_v52, 0.0 }
 0x1fc   :  { %v577_v57 = vmax.f32 %v507_v55, 0.0  ;;  %v865_v58 = vpop.f32.mrb[4].mxu1  ;;  %982 = vmatpush3.bf16.msra.mxu0 %v981_v54 }
 0x1fd   :  { %v522_v59 = vadd.f32 %v865_v58, %v378_v41  ;;  %v516_v60 = vpop.f32.mrb[5].mxu1  ;;  %983 = vmatprep.subr.bf16.mxu0 %v1036_v35 }
 0x1fe   :  { %v984_v62 = vpack.c.bf16 %v578_v56, %v577_v57  ;;  %v517_v63 = vadd.f32 %v516_v60, %v373_v42 }
 0x1ff   :  { %v580_v1 = vmax.f32 %v522_v59, 0.0 }
 0x200   :  { %v579_v2 = vmax.f32 %v517_v63, 0.0  ;;  %v868_v3 = vpop.f32.mrb[6].mxu1  ;;  %985 = vmatpush3.bf16.msra.mxu0 %v984_v62 }
 0x201   :  { %v532_v4 = vadd.f32 %v868_v3, %v388_v48  ;;  %v526_v5 = vpop.f32.mrb[7].mxu1  ;;  %986 = vmatprep.subr.bf16.mxu0 %v1036_v35  ;;  %v599_v48 = vshrl.u32 %v598_v47, 7 }
 0x202   :  { %v987_v6 = vpack.c.bf16 %v580_v1, %v579_v2  ;;  %v527_v7 = vadd.f32 %v526_v5, %v383_v51 }
 0x203   :  { %v582_v8 = vmax.f32 %v532_v4, 0.0  ;;  %v600_v49 = vsub.s32 0, %v599_v48 }
 0x204   :  { %v581_v10 = vmax.f32 %v527_v7, 0.0  ;;  %v871_v11 = vpop.f32.mrb[8].mxu1  ;;  %988 = vmatpush3.bf16.msra.mxu0 %v987_v6 }
 0x205   :  { %v542_v13 = vadd.f32 %v871_v11, %v398_v61  ;;  %v536_v14 = vpop.f32.mrb[9].mxu1  ;;  %989 = vmatprep.subr.bf16.mxu0 %v1036_v35  ;;  %v601_v51 = vrot.slane %v596_v50, %v600_v49 }
 0x206   :  { %v990_v15 = vpack.c.bf16 %v582_v8, %v581_v10  ;;  %v537_v16 = vadd.f32 %v536_v14, %v393_v0 }
 0x207   :  { %v584_v17 = vmax.f32 %v542_v13, 0.0 }
 0x208   :  { %v583_v18 = vmax.f32 %v537_v16, 0.0  ;;  %v874_v19 = vpop.f32.mrb[10].mxu1  ;;  %991 = vmatpush3.bf16.msra.mxu0 %v990_v15 }
 0x209   :  { %v552_v20 = vadd.f32 %v874_v19, %v408_v9  ;;  %v546_v21 = vpop.f32.mrb[11].mxu1  ;;  %992 = vmatprep.subr.bf16.mxu0 %v1036_v35 }
 0x20a   :  { %v993_v23 = vpack.c.bf16 %v584_v17, %v583_v18  ;;  %v547_v24 = vadd.f32 %v546_v21, %v403_v12 }
 0x20b   :  { %v586_v26 = vmax.f32 %v552_v20, 0.0 }
 0x20c   :  { %v585_v27 = vmax.f32 %v547_v24, 0.0  ;;  %v877_v28 = vpop.f32.mrb[12].mxu1  ;;  %994 = vmatpush3.bf16.msra.mxu0 %v993_v23 }
 0x20d   :  { %v562_v29 = vadd.f32 %v877_v28, %v418_v22  ;;  %v556_v30 = vpop.f32.mrb[13].mxu1  ;;  %995 = vmatprep.subr.bf16.mxu0 %v1036_v35 }
 0x20e   :  { %v996_v31 = vpack.c.bf16 %v586_v26, %v585_v27  ;;  %v557_v32 = vadd.f32 %v556_v30, %v413_v25 }
 0x20f   :  { %v588_v33 = vmax.f32 %v562_v29, 0.0 }
 0x210   :  { %v587_v36 = vmax.f32 %v557_v32, 0.0  ;;  %v880_v37 = vpop.f32.mrb[14].mxu1  ;;  %997 = vmatpush3.bf16.msra.mxu0 %v996_v31 }
 0x211   :  { %v572_v39 = vadd.f32 %v880_v37, %v428_v34  ;;  %v566_v40 = vpop.f32.mrb[15].mxu1  ;;  %998 = vmatprep.subr.bf16.mxu0 %v1036_v35 }
 0x212   :  { %v999_v41 = vpack.c.bf16 %v588_v33, %v587_v36  ;;  %v567_v42 = vadd.f32 %v566_v40, %v423_v38 }
 0x213   :  { %v590_v43 = vmax.f32 %v572_v39, 0.0 }
 0x214   :  { %v589_v44 = vmax.f32 %v567_v42, 0.0  ;;  %1000 = vmatpush3.bf16.msra.mxu0 %v999_v41 }
 0x215   :  { %1001 = vmatprep.subr.bf16.mxu0 %v1036_v35 }
 0x216   :  { %v1002_v45 = vpack.c.bf16 %v590_v43, %v589_v44 }
 0x218   :  { %1003 = vmatpush3.bf16.msra.mxu0 %v1002_v45 }
 0x21b   :  { %914 = vmatmul.mubr.f32.vlgmr.msra.gmra.mrb[16].mxu0 %v591_v46 }
 0x2ee   :  { %v668_v52 = vpop.f32.mrb[16].mxu0 }
 0x2ef   :  { %v669_v53 = vadd.f32 %v668_v52, %v601_v51  ;;  %v915_v54 = vpop.f32.mrb[17].mxu0 }
 0x2f1   :  { %673 = vst.msk [vmem:[#allocation3] sm:$0x1] %vm672_vm1, %v669_v53 }
 0x2f2   :  { %1022 = shalt.err (!%p1019_p4)
}
 0x2f3   :  { %s1023_s11 = scalar_lea.hbm %s1353_s7, 16 }
 0x2f4   :  { %p1024_p5 = scmp.ne.s32.totalorder %s1353_s7, %s1023_s11  ;;  %p1027_p6 = scmp.lt.u32.totalorder %s1023_s11, %s1353_s7 }
 0x2f6   :  { %p1029_p7 = pnand %p1027_p6, %p1024_p5 }
 0x2f8   :  { %1032 = shalt.err (!%p1029_p7)
}
 0x2f9   :  { %683 = dma.vmem_to_hbm [thread:$0]  %s681_s2, 16, %s1353_s7, [#allocation4]  }
 0x2fa   :  { %1033 = dma.done.wait [#allocation4], 16  }
 0x2fb   :  { %1034 = vsyncadd [#allocation4], 4294967280 }
 0x2fc   :  { %687 = vsyncpa [#allocation4], 1 }

// kernel: tpu_custom_call.1
= control target key start
LH: loop header
LB: loop body
LE: loop exit
PB: predicated region body
PF: predicated region fallthrough
CT: control target
= control target key end

     0   :  { %s1346_s0 = inlined_call_operand.vmem [shape: f32[128,8], index: 0, kind: input, shape index: {}]   ;;  %s1347_s1 = inlined_call_operand.vmem [shape: f32[128,128], index: 1, kind: input, shape index: {}]   ;;  %s1348_s2 = inlined_call_operand.vmem [shape: f32[128,1], index: 2, kind: input, shape index: {}]   ;;  %s1349_s3 = inlined_call_operand.vmem [shape: f32[128,128], index: 3, kind: input, shape index: {}]   ;;  %s1350_s4 = inlined_call_operand.vmem [shape: f32[128,1], index: 4, kind: input, shape index: {}]   ;;  %s1351_s5 = inlined_call_operand.vmem [shape: f32[1,128], index: 5, kind: input, shape index: {}]   ;;  %s1352_s6 = inlined_call_operand.<no memory space> [shape: f32[1,1], index: 6, kind: input, shape index: {}]   ;;  %s1353_s7 = inlined_call_operand.hbm [shape: f32[1,8], index: 7, kind: output, shape index: {}]  }
   0x1   :  { %v12_v0 = vstv %s1352_s6 }
   0x2   :  { %13 = vst [vmem:[#allocation2] sm:$0x1] %v12_v0 }
   0x3   :  { %v29_v1 = vld [vmem:[%s1346_s0] sm:$0xff]  ;;  %v30_v2 = vld [vmem:[%s1346_s0 + $0x8] sm:$0xff]  ;;  %v31_v3 = vld [vmem:[%s1346_s0 + $0x10] sm:$0xff]  ;;  %v1035_v6 = vmov 0  }
   0x4   :  { %v916_v4 = vpack.c.bf16 %v30_v2, %v29_v1  ;;  %v32_v5 = vld [vmem:[%s1346_s0 + $0x18] sm:$0xff]  ;;  %1009 = vset.pattern.permute.xlu0 %v1035_v6  ;;  %1010 = vset.pattern.permute.xlu1 %v1035_v6  ;;  %v33_v8 = vld [vmem:[%s1346_s0 + $0x20] sm:$0xff]  ;;  %v34_v9 = vld [vmem:[%s1346_s0 + $0x28] sm:$0xff] }
   0x5   :  { %v920_v7 = vpack.c.bf16 %v32_v5, %v31_v3  ;;  %v924_v10 = vpack.c.bf16 %v34_v9, %v33_v8  ;;  %v45_v11 = vld [vmem:[%s1347_s1] sm:$0xff]  ;;  %v35_v12 = vld [vmem:[%s1346_s0 + $0x30] sm:$0xff]  ;;  %v36_v13 = vld [vmem:[%s1346_s0 + $0x38] sm:$0xff] }
   0x6   :  { %917 = vmatprep.subr.bf16.mxu0 %v916_v4  ;;  %801 = vmatprep.mubr.f32.mxu0 %v45_v11  ;;  %v61_v14 = vld [vmem:[%s1348_s2] sm:$0xff]  ;;  %v928_v15 = vpack.c.bf16 %v36_v13, %v35_v12  ;;  %v38_v17 = vld [vmem:[%s1346_s0 + $0x48] sm:$0xff]  ;;  %v63_v19 = vld [vmem:[%s1348_s2 + $0x10] sm:$0xff] }
   0x7   :  { %919 = vmatpush3.bf16.msra.mxu0 %v916_v4  ;;  %v37_v16 = vld [vmem:[%s1346_s0 + $0x40] sm:$0xff]  ;;  %79 = vperm.xlu0 %1009, %v61_v14   ;;  %v62_v18 = vld [vmem:[%s1348_s2 + $0x8] sm:$0xff]  ;;  %v64_v20 = vld [vmem:[%s1348_s2 + $0x18] sm:$0xff] }
   0x8   :  { %921 = vmatprep.subr.bf16.mxu0 %v920_v7  ;;  %89 = vperm.xlu1 %1010, %v63_v19   ;;  %v932_v21 = vpack.c.bf16 %v38_v17, %v37_v16  ;;  %v39_v22 = vld [vmem:[%s1346_s0 + $0x50] sm:$0xff]  ;;  %v40_v23 = vld [vmem:[%s1346_s0 + $0x58] sm:$0xff]  ;;  %v65_v24 = vld [vmem:[%s1348_s2 + $0x20] sm:$0xff] }
   0x9   :  { %v66_v25 = vld [vmem:[%s1348_s2 + $0x28] sm:$0xff]  ;;  %v936_v26 = vpack.c.bf16 %v40_v23, %v39_v22  ;;  %v41_v27 = vld [vmem:[%s1346_s0 + $0x60] sm:$0xff]  ;;  %v67_v29 = vld [vmem:[%s1348_s2 + $0x30] sm:$0xff] }
   0xa   :  { %v42_v28 = vld [vmem:[%s1346_s0 + $0x68] sm:$0xff]  ;;  %v68_v30 = vld [vmem:[%s1348_s2 + $0x38] sm:$0xff] }
   0xb   :  { %923 = vmatpush3.bf16.msra.mxu0 %v920_v7  ;;  %84 = vperm.xlu0 %1009, %v62_v18   ;;  %v940_v31 = vpack.c.bf16 %v42_v28, %v41_v27 }
   0xc   :  { %925 = vmatprep.subr.bf16.mxu0 %v924_v10  ;;  %94 = vperm.xlu1 %1010, %v64_v20  }
   0xf   :  { %927 = vmatpush3.bf16.msra.mxu0 %v924_v10  ;;  %99 = vperm.xlu0 %1009, %v65_v24  }
  0x10   :  { %929 = vmatprep.subr.bf16.mxu0 %v928_v15  ;;  %104 = vperm.xlu1 %1010, %v66_v25  }
  0x13   :  { %931 = vmatpush3.bf16.msra.mxu0 %v928_v15  ;;  %109 = vperm.xlu0 %1009, %v67_v29  }
  0x14   :  { %933 = vmatprep.subr.bf16.mxu0 %v932_v21 }
  0x17   :  { %935 = vmatpush3.bf16.msra.mxu0 %v932_v21 }
  0x18   :  { %937 = vmatprep.subr.bf16.mxu0 %v936_v26 }
  0x19   :  { %14 = vsyncpa [#allocation4], 0  ;;  %v43_v32 = vld [vmem:[%s1346_s0 + $0x70] sm:$0xff]  ;;  %v44_v33 = vld [vmem:[%s1346_s0 + $0x78] sm:$0xff]  ;;  %114 = vperm.xlu1 %1010, %v68_v30   ;;  %vm1037_vm0 = vmmov 0   ;;  %s1039_s9 = smov [#allocation3]  }
  0x1a   :  { %v69_v34 = vld [vmem:[%s1348_s2 + $0x40] sm:$0xff]  ;;  %v70_v35 = vld [vmem:[%s1348_s2 + $0x48] sm:$0xff]  ;;  %v944_v36 = vpack.c.bf16 %v44_v33, %v43_v32  ;;  %v71_v37 = vld [vmem:[%s1348_s2 + $0x50] sm:$0xff]  ;;  %vm672_vm1 = vcmask 57344  }
  0x1b   :  { %939 = vmatpush3.bf16.msra.mxu0 %v936_v26  ;;  %119 = vperm.xlu0 %1009, %v69_v34   ;;  %v72_v38 = vld [vmem:[%s1348_s2 + $0x58] sm:$0xff]  ;;  %v73_v39 = vld [vmem:[%s1348_s2 + $0x60] sm:$0xff]  ;;  %v46_v40 = vld [vmem:[%s1347_s1 + $0x8] sm:$0xff] }
  0x1c   :  { %941 = vmatprep.subr.bf16.mxu0 %v940_v31  ;;  %v74_v41 = vld [vmem:[%s1348_s2 + $0x68] sm:$0xff]  ;;  %v47_v42 = vld [vmem:[%s1347_s1 + $0x10] sm:$0xff]  ;;  %v48_v44 = vld [vmem:[%s1347_s1 + $0x18] sm:$0xff] }
  0x1d   :  { %124 = vperm.xlu1 %1010, %v70_v35   ;;  %v75_v43 = vld [vmem:[%s1348_s2 + $0x70] sm:$0xff]  ;;  %v76_v45 = vld [vmem:[%s1348_s2 + $0x78] sm:$0xff]  ;;  %v49_v46 = vld [vmem:[%s1347_s1 + $0x20] sm:$0xff]  ;;  %s680_s2 = sshll.u32 %s1039_s9, 4  ;;  %s681_s2 = int_to_ptr.vmem [resolvable:$true] %s680_s2 }
  0x1e   :  { %v334_v47 = vld [vmem:[%s1350_s4] sm:$0xff]  ;;  %v50_v48 = vld [vmem:[%s1347_s1 + $0x28] sm:$0xff]  ;;  %v51_v50 = vld [vmem:[%s1347_s1 + $0x30] sm:$0xff]  ;;  %s1011_s10 = scalar_lea.vmem %s681_s2, 16  ;;  %s1015_s0 = scalar_lea.vmem %s681_s2, 32 }
  0x1f   :  { %943 = vmatpush3.bf16.msra.mxu0 %v940_v31  ;;  %129 = vperm.xlu0 %1009, %v71_v37   ;;  %v335_v49 = vld [vmem:[%s1350_s4 + $0x8] sm:$0xff]  ;;  %v336_v51 = vld [vmem:[%s1350_s4 + $0x10] sm:$0xff]  ;;  %v52_v52 = vld [vmem:[%s1347_s1 + $0x38] sm:$0xff]  ;;  %p1012_p0 = scmp.ne.s32.totalorder %s681_s2, %s1011_s10  ;;  %p1016_p1 = scmp.lt.s32.totalorder %s681_s2, %s681_s2 }
  0x20   :  { %945 = vmatprep.subr.bf16.mxu0 %v944_v36  ;;  %v337_v53 = vld [vmem:[%s1350_s4 + $0x18] sm:$0xff]  ;;  %v53_v54 = vld [vmem:[%s1347_s1 + $0x40] sm:$0xff]  ;;  %v54_v56 = vld [vmem:[%s1347_s1 + $0x48] sm:$0xff]  ;;  %p1017_p2 = scmp.lt.s32.totalorder %s1015_s0, %s1011_s10 }
  0x21   :  { %134 = vperm.xlu1 %1010, %v72_v38   ;;  %v338_v55 = vld [vmem:[%s1350_s4 + $0x20] sm:$0xff]  ;;  %v339_v57 = vld [vmem:[%s1350_s4 + $0x28] sm:$0xff]  ;;  %v55_v58 = vld [vmem:[%s1347_s1 + $0x50] sm:$0xff] }
  0x22   :  { %v340_v59 = vld [vmem:[%s1350_s4 + $0x30] sm:$0xff]  ;;  %v56_v60 = vld [vmem:[%s1347_s1 + $0x58] sm:$0xff]  ;;  %v57_v62 = vld [vmem:[%s1347_s1 + $0x60] sm:$0xff]  ;;  %p1018_p3 = por %p1017_p2, %p1016_p1 }
  0x23   :  { %947 = vmatpush3.bf16.msra.mxu0 %v944_v36  ;;  %139 = vperm.xlu0 %1009, %v73_v39   ;;  %v341_v61 = vld [vmem:[%s1350_s4 + $0x38] sm:$0xff]  ;;  %v342_v63 = vld [vmem:[%s1350_s4 + $0x40] sm:$0xff]  ;;  %v58_v0 = vld [vmem:[%s1347_s1 + $0x68] sm:$0xff] }
  0x24   :  { %v343_v1 = vld [vmem:[%s1350_s4 + $0x48] sm:$0xff]  ;;  %v59_v2 = vld [vmem:[%s1347_s1 + $0x70] sm:$0xff]  ;;  %v60_v4 = vld [vmem:[%s1347_s1 + $0x78] sm:$0xff]  ;;  %p1019_p4 = pnand %p1018_p3, %p1012_p0 }
  0x25   :  { %144 = vperm.xlu1 %1010, %v74_v41   ;;  %v344_v3 = vld [vmem:[%s1350_s4 + $0x50] sm:$0xff]  ;;  %v345_v5 = vld [vmem:[%s1350_s4 + $0x58] sm:$0xff]  ;;  %v346_v6 = vld [vmem:[%s1350_s4 + $0x60] sm:$0xff] }
  0x26   :  { %802 = vmatmul.mubr.f32.vlgmr.msra.gmra.mrb[0].mxu0 %v46_v40  ;;  %v347_v7 = vld [vmem:[%s1350_s4 + $0x68] sm:$0xff]  ;;  %v348_v8 = vld [vmem:[%s1350_s4 + $0x70] sm:$0xff]  ;;  %v349_v9 = vld [vmem:[%s1350_s4 + $0x78] sm:$0xff] }
  0x27   :  { %804 = vmatprep.mubr.f32.mxu0 %v47_v42  ;;  %149 = vperm.xlu0 %1009, %v75_v43   ;;  %v592_v10 = vld [vmem:[#allocation2] sm:$0x1] }
  0x28   :  { %v318_v11 = vld [vmem:[%s1349_s3] sm:$0xff] }
  0x29   :  { %154 = vperm.xlu1 %1010, %v76_v45   ;;  %857 = vmatprep.mubr.f32.mxu1 %v318_v11 }
  0x2a   :  { %805 = vmatmul.mubr.f32.gmra.mrb[2].mxu0 %v48_v44 }
  0x2b   :  { %807 = vmatprep.mubr.f32.mxu0 %v49_v46  ;;  %352 = vperm.xlu0 %1009, %v334_v47  }
  0x2d   :  { %357 = vperm.xlu1 %1010, %v335_v49  }
  0x2e   :  { %808 = vmatmul.mubr.f32.gmra.mrb[4].mxu0 %v50_v48 }
  0x2f   :  { %810 = vmatprep.mubr.f32.mxu0 %v51_v50  ;;  %362 = vperm.xlu0 %1009, %v336_v51  }
  0x31   :  { %367 = vperm.xlu1 %1010, %v337_v53  }
  0x32   :  { %811 = vmatmul.mubr.f32.gmra.mrb[6].mxu0 %v52_v52 }
  0x33   :  { %813 = vmatprep.mubr.f32.mxu0 %v53_v54  ;;  %372 = vperm.xlu0 %1009, %v338_v55  }
  0x35   :  { %377 = vperm.xlu1 %1010, %v339_v57  }
  0x36   :  { %814 = vmatmul.mubr.f32.gmra.mrb[8].mxu0 %v54_v56 }
  0x37   :  { %816 = vmatprep.mubr.f32.mxu0 %v55_v58  ;;  %382 = vperm.xlu0 %1009, %v340_v59  }
  0x39   :  { %387 = vperm.xlu1 %1010, %v341_v61  }
  0x3a   :  { %817 = vmatmul.mubr.f32.gmra.mrb[10].mxu0 %v56_v60 }
  0x3b   :  { %819 = vmatprep.mubr.f32.mxu0 %v57_v62  ;;  %392 = vperm.xlu0 %1009, %v342_v63  }
  0x3d   :  { %397 = vperm.xlu1 %1010, %v343_v1  }
  0x3e   :  { %820 = vmatmul.mubr.f32.gmra.mrb[12].mxu0 %v58_v0 }
  0x3f   :  { %822 = vmatprep.mubr.f32.mxu0 %v59_v2  ;;  %402 = vperm.xlu0 %1009, %v344_v3  }
  0x41   :  { %407 = vperm.xlu1 %1010, %v345_v5  }
  0x42   :  { %823 = vmatmul.mubr.f32.gmra.mrb[14].mxu0 %v60_v4 }
  0x43   :  { %412 = vperm.xlu0 %1009, %v346_v6  }
  0x45   :  { %417 = vperm.xlu1 %1010, %v347_v7  }
  0x47   :  { %422 = vperm.xlu0 %1009, %v348_v8  }
  0x49   :  { %427 = vperm.xlu1 %1010, %v349_v9  }
  0x4b   :  { %595 = vperm.xlu0 %1009, %v592_v10  }
  0x86   :  { %v80_v13 = vpop.permute.xlu0 %79 }
  0x87   :  { %v90_v12 = vpop.permute.xlu1 %89 }
  0x8a   :  { %v85_v15 = vpop.permute.xlu0 %84 }
  0x8b   :  { %v95_v14 = vpop.permute.xlu1 %94 }
  0x8e   :  { %v100_v17 = vpop.permute.xlu0 %99 }
  0x8f   :  { %v105_v16 = vpop.permute.xlu1 %104 }
  0x92   :  { %v110_v26 = vpop.permute.xlu0 %109 }
  0x98   :  { %v115_v23 = vpop.permute.xlu1 %114 }
  0x9a   :  { %v120_v39 = vpop.permute.xlu0 %119 }
  0x9c   :  { %v125_v36 = vpop.permute.xlu1 %124 }
  0x9e   :  { %v130_v51 = vpop.permute.xlu0 %129 }
  0xa0   :  { %v135_v48 = vpop.permute.xlu1 %134 }
  0xa2   :  { %v140_v0 = vpop.permute.xlu0 %139 }
  0xa4   :  { %v145_v61 = vpop.permute.xlu1 %144 }
  0xa8   :  { %v155_v9 = vpop.permute.xlu1 %154 }
  0xf9   :  { %v803_v18 = vpop.f32.mrb[0].mxu0 }
  0xfa   :  { %v229_v19 = vadd.f32 %v803_v18, %v85_v15  ;;  %v223_v20 = vpop.f32.mrb[1].mxu0 }
  0xfb   :  { %v224_v21 = vadd.f32 %v223_v20, %v80_v13  ;;  %v319_v20 = vld [vmem:[%s1349_s3 + $0x8] sm:$0xff] }
  0xfc   :  { %v303_v22 = vmax.f32 %v229_v19, 0.0 }
  0xfd   :  { %v302_v24 = vmax.f32 %v224_v21, 0.0  ;;  %v806_v25 = vpop.f32.mrb[2].mxu0  ;;  %v320_v21 = vld [vmem:[%s1349_s3 + $0x10] sm:$0xff] }
  0xfe   :  { %v239_v27 = vadd.f32 %v806_v25, %v95_v14  ;;  %v233_v28 = vpop.f32.mrb[3].mxu0  ;;  %v324_v25 = vld [vmem:[%s1349_s3 + $0x30] sm:$0xff] }
  0xff   :  { %v234_v29 = vadd.f32 %v233_v28, %v90_v12  ;;  %v948_v30 = vpack.c.bf16 %v303_v22, %v302_v24  ;;  %v150_v12 = vpop.permute.xlu0 %149  ;;  %v321_v22 = vld [vmem:[%s1349_s3 + $0x18] sm:$0xff]  ;;  %v323_v24 = vld [vmem:[%s1349_s3 + $0x28] sm:$0xff] }
 0x100   :  { %v305_v31 = vmax.f32 %v239_v27, 0.0  ;;  %v326_v27 = vld [vmem:[%s1349_s3 + $0x40] sm:$0xff]  ;;  %v327_v28 = vld [vmem:[%s1349_s3 + $0x48] sm:$0xff] }
 0x101   :  { %v304_v32 = vmax.f32 %v234_v29, 0.0  ;;  %v809_v33 = vpop.f32.mrb[4].mxu0  ;;  %949 = vmatprep.subr.bf16.mxu1 %v948_v30  ;;  %v328_v29 = vld [vmem:[%s1349_s3 + $0x50] sm:$0xff] }
 0x102   :  { %v249_v34 = vadd.f32 %v809_v33, %v105_v16  ;;  %v243_v35 = vpop.f32.mrb[5].mxu0  ;;  %951 = vmatpush3.bf16.msra.mxu1 %v948_v30  ;;  %v329_v30 = vld [vmem:[%s1349_s3 + $0x58] sm:$0xff]  ;;  %v332_v33 = vld [vmem:[%s1349_s3 + $0x70] sm:$0xff] }
 0x103   :  { %v952_v37 = vpack.c.bf16 %v305_v31, %v304_v32  ;;  %v244_v38 = vadd.f32 %v243_v35, %v100_v17  ;;  %v330_v31 = vld [vmem:[%s1349_s3 + $0x60] sm:$0xff]  ;;  %v331_v32 = vld [vmem:[%s1349_s3 + $0x68] sm:$0xff]  ;;  %v1036_v35 = vmov 0.0|0.0  }
 0x104   :  { %v307_v40 = vmax.f32 %v249_v34, 0.0  ;;  %v333_v34 = vld [vmem:[%s1349_s3 + $0x78] sm:$0xff]  ;;  %980 = vmatprep.subr.bf16.mxu0 %v1036_v35 }
 0x105   :  { %v306_v41 = vmax.f32 %v244_v38, 0.0  ;;  %v812_v42 = vpop.f32.mrb[6].mxu0  ;;  %953 = vmatprep.subr.bf16.mxu1 %v952_v37  ;;  %v353_v38 = vpop.permute.xlu0 %352 }
 0x106   :  { %v259_v43 = vadd.f32 %v812_v42, %v115_v23  ;;  %v253_v44 = vpop.f32.mrb[7].mxu0  ;;  %955 = vmatpush3.bf16.msra.mxu1 %v952_v37  ;;  %v322_v23 = vld [vmem:[%s1349_s3 + $0x20] sm:$0xff]  ;;  %v358_v37 = vpop.permute.xlu1 %357 }
 0x107   :  { %v956_v45 = vpack.c.bf16 %v307_v40, %v306_v41  ;;  %v254_v46 = vadd.f32 %v253_v44, %v110_v26  ;;  %v325_v26 = vld [vmem:[%s1349_s3 + $0x38] sm:$0xff] }
 0x108   :  { %v309_v47 = vmax.f32 %v259_v43, 0.0 }
 0x109   :  { %v308_v49 = vmax.f32 %v254_v46, 0.0  ;;  %v815_v50 = vpop.f32.mrb[8].mxu0  ;;  %957 = vmatprep.subr.bf16.mxu1 %v956_v45  ;;  %v363_v40 = vpop.permute.xlu0 %362 }
 0x10a   :  { %v269_v52 = vadd.f32 %v815_v50, %v125_v36  ;;  %v263_v53 = vpop.f32.mrb[9].mxu0  ;;  %959 = vmatpush3.bf16.msra.mxu1 %v956_v45  ;;  %v1038_v36 = vmov 0.0  }
 0x10b   :  { %v960_v54 = vpack.c.bf16 %v309_v47, %v308_v49  ;;  %v264_v55 = vadd.f32 %v263_v53, %v120_v39  ;;  %913 = vmatprep.mubr.msk.f32.mxu0 %vm1037_vm0, %v1038_v36  ;;  %v368_v39 = vpop.permute.xlu1 %367 }
 0x10c   :  { %v311_v56 = vmax.f32 %v269_v52, 0.0 }
 0x10d   :  { %v310_v57 = vmax.f32 %v264_v55, 0.0  ;;  %v818_v58 = vpop.f32.mrb[10].mxu0  ;;  %961 = vmatprep.subr.bf16.mxu1 %v960_v54  ;;  %v373_v42 = vpop.permute.xlu0 %372 }
 0x10e   :  { %v279_v59 = vadd.f32 %v818_v58, %v135_v48  ;;  %v273_v60 = vpop.f32.mrb[11].mxu0  ;;  %963 = vmatpush3.bf16.msra.mxu1 %v960_v54 }
 0x10f   :  { %v964_v62 = vpack.c.bf16 %v311_v56, %v310_v57  ;;  %v274_v63 = vadd.f32 %v273_v60, %v130_v51  ;;  %v378_v41 = vpop.permute.xlu1 %377 }
 0x110   :  { %v313_v1 = vmax.f32 %v279_v59, 0.0 }
 0x111   :  { %v312_v2 = vmax.f32 %v274_v63, 0.0  ;;  %v821_v3 = vpop.f32.mrb[12].mxu0  ;;  %965 = vmatprep.subr.bf16.mxu1 %v964_v62  ;;  %v383_v51 = vpop.permute.xlu0 %382 }
 0x112   :  { %v289_v4 = vadd.f32 %v821_v3, %v145_v61  ;;  %v283_v5 = vpop.f32.mrb[13].mxu0  ;;  %967 = vmatpush3.bf16.msra.mxu1 %v964_v62 }
 0x113   :  { %v968_v6 = vpack.c.bf16 %v313_v1, %v312_v2  ;;  %v284_v7 = vadd.f32 %v283_v5, %v140_v0  ;;  %v388_v48 = vpop.permute.xlu1 %387 }
 0x114   :  { %v315_v8 = vmax.f32 %v289_v4, 0.0 }
 0x115   :  { %v314_v10 = vmax.f32 %v284_v7, 0.0  ;;  %v824_v11 = vpop.f32.mrb[14].mxu0  ;;  %969 = vmatprep.subr.bf16.mxu1 %v968_v6  ;;  %v393_v0 = vpop.permute.xlu0 %392 }
 0x116   :  { %v299_v13 = vadd.f32 %v824_v11, %v155_v9  ;;  %v293_v14 = vpop.f32.mrb[15].mxu0  ;;  %971 = vmatpush3.bf16.msra.mxu1 %v968_v6 }
 0x117   :  { %v972_v15 = vpack.c.bf16 %v315_v8, %v314_v10  ;;  %v294_v16 = vadd.f32 %v293_v14, %v150_v12  ;;  %v398_v61 = vpop.permute.xlu1 %397 }
 0x118   :  { %v317_v17 = vmax.f32 %v299_v13, 0.0 }
 0x119   :  { %v316_v18 = vmax.f32 %v294_v16, 0.0  ;;  %973 = vmatprep.subr.bf16.mxu1 %v972_v15  ;;  %v403_v12 = vpop.permute.xlu0 %402 }
 0x11a   :  { %975 = vmatpush3.bf16.msra.mxu1 %v972_v15 }
 0x11b   :  { %v976_v19 = vpack.c.bf16 %v317_v17, %v316_v18  ;;  %v408_v9 = vpop.permute.xlu1 %407 }
 0x11d   :  { %977 = vmatprep.subr.bf16.mxu1 %v976_v19 }
 0x11e   :  { %979 = vmatpush3.bf16.msra.mxu1 %v976_v19 }
 0x121   :  { %858 = vmatmul.mubr.f32.vlgmr.msra.gmra.mrb[0].mxu1 %v319_v20 }
 0x122   :  { %860 = vmatprep.mubr.f32.mxu1 %v320_v21 }
 0x125   :  { %861 = vmatmul.mubr.f32.gmra.mrb[2].mxu1 %v321_v22  ;;  %v418_v22 = vpop.permute.xlu1 %417 }
 0x126   :  { %863 = vmatprep.mubr.f32.mxu1 %v322_v23 }
 0x129   :  { %864 = vmatmul.mubr.f32.gmra.mrb[4].mxu1 %v323_v24 }
 0x12a   :  { %866 = vmatprep.mubr.f32.mxu1 %v324_v25  ;;  %v413_v25 = vpop.permute.xlu0 %412 }
 0x12d   :  { %867 = vmatmul.mubr.f32.gmra.mrb[6].mxu1 %v325_v26 }
 0x12e   :  { %869 = vmatprep.mubr.f32.mxu1 %v326_v27 }
 0x131   :  { %870 = vmatmul.mubr.f32.gmra.mrb[8].mxu1 %v327_v28 }
 0x132   :  { %872 = vmatprep.mubr.f32.mxu1 %v328_v29 }
 0x135   :  { %873 = vmatmul.mubr.f32.gmra.mrb[10].mxu1 %v329_v30 }
 0x136   :  { %875 = vmatprep.mubr.f32.mxu1 %v330_v31 }
 0x139   :  { %876 = vmatmul.mubr.f32.gmra.mrb[12].mxu1 %v331_v32 }
 0x13a   :  { %878 = vmatprep.mubr.f32.mxu1 %v332_v33 }
 0x13d   :  { %879 = vmatmul.mubr.f32.gmra.mrb[14].mxu1 %v333_v34  ;;  %v428_v34 = vpop.permute.xlu1 %427 }
 0x1f4   :  { %v859_v43 = vpop.f32.mrb[0].mxu1 }
 0x1f5   :  { %v502_v44 = vadd.f32 %v859_v43, %v358_v37  ;;  %v496_v45 = vpop.f32.mrb[1].mxu1 }
 0x1f6   :  { %v497_v46 = vadd.f32 %v496_v45, %v353_v38  ;;  %v423_v38 = vpop.permute.xlu0 %422 }
 0x1f7   :  { %v576_v47 = vmax.f32 %v502_v44, 0.0 }
 0x1f8   :  { %v575_v49 = vmax.f32 %v497_v46, 0.0  ;;  %v862_v50 = vpop.f32.mrb[2].mxu1  ;;  %v591_v46 = vld [vmem:[%s1351_s5] sm:$0x1] }
 0x1f9   :  { %v512_v52 = vadd.f32 %v862_v50, %v368_v39  ;;  %v506_v53 = vpop.f32.mrb[3].mxu1 }
 0x1fa   :  { %v981_v54 = vpack.c.bf16 %v576_v47, %v575_v49  ;;  %v507_v55 = vadd.f32 %v506_v53, %v363_v40  ;;  %v598_v47 = vlaneseq  ;;  %v596_v50 = vpop.permute.xlu0 %595 }
 0x1fb   :  { %v578_v56 = vmax.f32 %v512_v52, 0.0 }
 0x1fc   :  { %v577_v57 = vmax.f32 %v507_v55, 0.0  ;;  %v865_v58 = vpop.f32.mrb[4].mxu1  ;;  %982 = vmatpush3.bf16.msra.mxu0 %v981_v54 }
 0x1fd   :  { %v522_v59 = vadd.f32 %v865_v58, %v378_v41  ;;  %v516_v60 = vpop.f32.mrb[5].mxu1  ;;  %983 = vmatprep.subr.bf16.mxu0 %v1036_v35 }
 0x1fe   :  { %v984_v62 = vpack.c.bf16 %v578_v56, %v577_v57  ;;  %v517_v63 = vadd.f32 %v516_v60, %v373_v42 }
 0x1ff   :  { %v580_v1 = vmax.f32 %v522_v59, 0.0 }
 0x200   :  { %v579_v2 = vmax.f32 %v517_v63, 0.0  ;;  %v868_v3 = vpop.f32.mrb[6].mxu1  ;;  %985 = vmatpush3.bf16.msra.mxu0 %v984_v62 }
 0x201   :  { %v532_v4 = vadd.f32 %v868_v3, %v388_v48  ;;  %v526_v5 = vpop.f32.mrb[7].mxu1  ;;  %986 = vmatprep.subr.bf16.mxu0 %v1036_v35  ;;  %v599_v48 = vshrl.u32 %v598_v47, 7 }
 0x202   :  { %v987_v6 = vpack.c.bf16 %v580_v1, %v579_v2  ;;  %v527_v7 = vadd.f32 %v526_v5, %v383_v51 }
 0x203   :  { %v582_v8 = vmax.f32 %v532_v4, 0.0  ;;  %v600_v49 = vsub.s32 0, %v599_v48 }
 0x204   :  { %v581_v10 = vmax.f32 %v527_v7, 0.0  ;;  %v871_v11 = vpop.f32.mrb[8].mxu1  ;;  %988 = vmatpush3.bf16.msra.mxu0 %v987_v6 }
 0x205   :  { %v542_v13 = vadd.f32 %v871_v11, %v398_v61  ;;  %v536_v14 = vpop.f32.mrb[9].mxu1  ;;  %989 = vmatprep.subr.bf16.mxu0 %v1036_v35  ;;  %v601_v51 = vrot.slane %v596_v50, %v600_v49 }
 0x206   :  { %v990_v15 = vpack.c.bf16 %v582_v8, %v581_v10  ;;  %v537_v16 = vadd.f32 %v536_v14, %v393_v0 }
 0x207   :  { %v584_v17 = vmax.f32 %v542_v13, 0.0 }
 0x208   :  { %v583_v18 = vmax.f32 %v537_v16, 0.0  ;;  %v874_v19 = vpop.f32.mrb[10].mxu1  ;;  %991 = vmatpush3.bf16.msra.mxu0 %v990_v15 }
 0x209   :  { %v552_v20 = vadd.f32 %v874_v19, %v408_v9  ;;  %v546_v21 = vpop.f32.mrb[11].mxu1  ;;  %992 = vmatprep.subr.bf16.mxu0 %v1036_v35 }
 0x20a   :  { %v993_v23 = vpack.c.bf16 %v584_v17, %v583_v18  ;;  %v547_v24 = vadd.f32 %v546_v21, %v403_v12 }
 0x20b   :  { %v586_v26 = vmax.f32 %v552_v20, 0.0 }
 0x20c   :  { %v585_v27 = vmax.f32 %v547_v24, 0.0  ;;  %v877_v28 = vpop.f32.mrb[12].mxu1  ;;  %994 = vmatpush3.bf16.msra.mxu0 %v993_v23 }
 0x20d   :  { %v562_v29 = vadd.f32 %v877_v28, %v418_v22  ;;  %v556_v30 = vpop.f32.mrb[13].mxu1  ;;  %995 = vmatprep.subr.bf16.mxu0 %v1036_v35 }
 0x20e   :  { %v996_v31 = vpack.c.bf16 %v586_v26, %v585_v27  ;;  %v557_v32 = vadd.f32 %v556_v30, %v413_v25 }
 0x20f   :  { %v588_v33 = vmax.f32 %v562_v29, 0.0 }
 0x210   :  { %v587_v36 = vmax.f32 %v557_v32, 0.0  ;;  %v880_v37 = vpop.f32.mrb[14].mxu1  ;;  %997 = vmatpush3.bf16.msra.mxu0 %v996_v31 }
 0x211   :  { %v572_v39 = vadd.f32 %v880_v37, %v428_v34  ;;  %v566_v40 = vpop.f32.mrb[15].mxu1  ;;  %998 = vmatprep.subr.bf16.mxu0 %v1036_v35 }
 0x212   :  { %v999_v41 = vpack.c.bf16 %v588_v33, %v587_v36  ;;  %v567_v42 = vadd.f32 %v566_v40, %v423_v38 }
 0x213   :  { %v590_v43 = vmax.f32 %v572_v39, 0.0 }
 0x214   :  { %v589_v44 = vmax.f32 %v567_v42, 0.0  ;;  %1000 = vmatpush3.bf16.msra.mxu0 %v999_v41 }
 0x215   :  { %1001 = vmatprep.subr.bf16.mxu0 %v1036_v35 }
 0x216   :  { %v1002_v45 = vpack.c.bf16 %v590_v43, %v589_v44 }
 0x218   :  { %1003 = vmatpush3.bf16.msra.mxu0 %v1002_v45 }
 0x21b   :  { %914 = vmatmul.mubr.f32.vlgmr.msra.gmra.mrb[16].mxu0 %v591_v46 }
 0x2ee   :  { %v668_v52 = vpop.f32.mrb[16].mxu0 }
 0x2ef   :  { %v669_v53 = vadd.f32 %v668_v52, %v601_v51  ;;  %v915_v54 = vpop.f32.mrb[17].mxu0 }
 0x2f1   :  { %673 = vst.msk [vmem:[#allocation3] sm:$0x1] %vm672_vm1, %v669_v53 }
 0x2f2   :  { %1022 = shalt.err (!%p1019_p4)
}
 0x2f3   :  { %s1023_s11 = scalar_lea.hbm %s1353_s7, 16 }
 0x2f4   :  { %p1024_p5 = scmp.ne.s32.totalorder %s1353_s7, %s1023_s11  ;;  %p1027_p6 = scmp.lt.u32.totalorder %s1023_s11, %s1353_s7 }
 0x2f6   :  { %p1029_p7 = pnand %p1027_p6, %p1024_p5 }
 0x2f8   :  { %1032 = shalt.err (!%p1029_p7)
}
 0x2f9   :  { %683 = dma.vmem_to_hbm [thread:$0]  %s681_s2, 16, %s1353_s7, [#allocation4]  }
 0x2fa   :  { %1033 = dma.done.wait [#allocation4], 16  }
 0x2fb   :  { %1034 = vsyncadd [#allocation4], 4294967280 }
 0x2fc   :  { %687 = vsyncpa [#allocation4], 1 }

</bundles_post_ra>
